<compile_context>
chip_gen: v7x
topology: tpu7x:2x2x1
jax: 0.10.0
libtpu: 0.0.40
codegen_flags: <defaults>
</compile_context>

<pallas_src>
import math

import numpy as np
import jax
import jax.numpy as jnp
from jax import lax
from jax.experimental import pallas as pl
from jax.experimental.pallas import tpu as pltpu

# ----------------------------- model config ---------------------------------
SEQ      = 8       # seq_len
BATCH    = 2       # batch_size
D_MODEL  = 32
N_HEAD   = 2
D_HID    = 64
N_LAYERS = 2
N_TOKEN  = 64
HEAD_DIM = D_MODEL // N_HEAD
LN_EPS   = 1e-5
BH       = BATCH * N_HEAD          # number of (batch, head) attention blocks

# ----------------------------- packed-slab geometry --------------------------
# QKV slab: per layer, 32 weight rows ([D, 3*128] with q/k/v 128-lane aligned)
# + 1 bias row, padded to an 8-row-aligned stride of 40.
QKV_W       = 3 * 128
Q_OFF, K_OFF, V_OFF = 0, 128, 256
QKV_L_ROWS  = 40
QKV_ROWS    = N_LAYERS * QKV_L_ROWS

# Misc slab (width 128): wo, w1, w2 and all bias/LN vectors per layer, plus the
# decoder weight/bias.  All section offsets are multiples of 8 (sublane tiles).
MISC_W      = 128
WO_OFF      = 0            # [D, D]       rows  0..31, cols 0..31
W1_OFF      = 32           # [D, D_HID]   rows 32..63, cols 0..63
W2_OFF      = 64           # [D_HID, D]   rows 64..127, cols 0..31
VEC_OFF     = 128          # 8 vector rows: bo,g1,beta1,g2,beta2,b1,b2,(pad)
MISC_L_ROWS = 136
DEC_W_OFF   = N_LAYERS * MISC_L_ROWS          # [D, N_TOKEN] rows, cols 0..63
DEC_B_ROW   = DEC_W_OFF + D_MODEL             # [1, N_TOKEN]
MISC_ROWS   = DEC_B_ROW + 8                   # 8-row padded total


def _vmem_spec():
    # every operand is tiny (~300 KB total) -> whole arrays resident in VMEM
    return pl.BlockSpec(memory_space=pltpu.MemorySpace.VMEM)


# ----------------------------- kernel ----------------------------------------
def _layer_norm(x, gamma, beta):
    # x: [N, D], gamma/beta: [1, D]; biased variance, matches nn.LayerNorm
    mean = jnp.mean(x, axis=-1, keepdims=True)
    c = x - mean
    var = jnp.mean(c * c, axis=-1, keepdims=True)
    return c * lax.rsqrt(var + LN_EPS) * gamma + beta


def fused_forward_kernel(src_ref, emb_ref, pe_ref, mask_ref,
                         qkv_ref, misc_ref, o_ref):
    """Fused forward pass.

    src_ref : int32 [SEQ, BATCH]      token ids
    emb_ref : f32  [N_TOKEN, D_MODEL] embedding table (sqrt(d_model) pre-folded)
    pe_ref  : f32  [BATCH*SEQ, D]     positional encoding pre-tiled batch-major
    mask_ref: f32  [BH*SEQ, BH*SEQ]   combined causal + cross-block additive mask
    qkv_ref : f32  [QKV_ROWS, 384]    packed QKV weights/biases (lane-aligned)
    misc_ref: f32  [MISC_ROWS, 128]   packed wo/w1/w2/vectors/decoder
    o_ref   : f32  [SEQ, BATCH*N_TOKEN] lane-dense output slab
    """
    # ---- embedding gather (one-hot matmul), batch-major rows b*SEQ + s -------
    ids = src_ref[...]                                           # [S, B] int32
    tok_iota = lax.broadcasted_iota(jnp.int32, (SEQ, N_TOKEN), 1)
    onehot = jnp.concatenate(
        [(tok_iota == ids[:, b:b + 1]).astype(jnp.float32) for b in range(BATCH)],
        axis=0)                                                  # [B*S, n_token]
    x = jnp.dot(onehot, emb_ref[...],
                preferred_element_type=jnp.float32) + pe_ref[...]   # [B*S, D]

    mask = mask_ref[...]                                         # [BH*S, BH*S]
    scale = 1.0 / math.sqrt(HEAD_DIM)

    # ---- statically unrolled encoder stack -----------------------------------
    for li in range(N_LAYERS):
        q0 = li * QKV_L_ROWS
        m0 = li * MISC_L_ROWS
        wqkv = qkv_ref[q0:q0 + D_MODEL, :]                        # [32, 384]
        bqkv = qkv_ref[q0 + D_MODEL:q0 + D_MODEL + 1, :]          # [1, 384]
        wo   = misc_ref[m0 + WO_OFF:m0 + WO_OFF + D_MODEL, :D_MODEL]
        w1   = misc_ref[m0 + W1_OFF:m0 + W1_OFF + D_MODEL, :D_HID]
        w2   = misc_ref[m0 + W2_OFF:m0 + W2_OFF + D_HID, :D_MODEL]
        vecs = misc_ref[m0 + VEC_OFF:m0 + VEC_OFF + 8, :]         # [8, 128]
        bo, g1, beta1 = vecs[0:1, :D_MODEL], vecs[1:2, :D_MODEL], vecs[2:3, :D_MODEL]
        g2, beta2     = vecs[3:4, :D_MODEL], vecs[4:5, :D_MODEL]
        b1, b2        = vecs[5:6, :D_HID], vecs[6:7, :D_MODEL]

        # fused QKV projection; q/k/v chunks start at 128-lane boundaries
        qkv = jnp.dot(x, wqkv, preferred_element_type=jnp.float32) + bqkv  # [16,384]

        # block-diagonal (batch, head) layout [B*H*S, hd] via sublane stacking
        def bd(off):
            return jnp.concatenate(
                [qkv[b * SEQ:(b + 1) * SEQ,
                     off + h * HEAD_DIM: off + (h + 1) * HEAD_DIM]
                 for b in range(BATCH) for h in range(N_HEAD)], axis=0)
        q_bd = bd(Q_OFF)                                          # [32, 16]
        k_bd = bd(K_OFF)
        v_bd = bd(V_OFF)

        # single scores matmul for all blocks; K consumed transposed by the MXU
        scores = lax.dot_general(q_bd, k_bd, (((1,), (1,)), ((), ())),
                                 preferred_element_type=jnp.float32)   # [32, 32]
        scores = scores * scale + mask
        scores = scores - jnp.max(scores, axis=-1, keepdims=True)
        p = jnp.exp(scores)
        p = p / jnp.sum(p, axis=-1, keepdims=True)                # exact softmax
        attn_bd = jnp.dot(p, v_bd, preferred_element_type=jnp.float32)  # [32, 16]

        # back to [B*S, D]: (batch, head) blocks -> rows x lanes
        attn = jnp.concatenate(
            [jnp.concatenate(
                [attn_bd[(b * N_HEAD + h) * SEQ:(b * N_HEAD + h + 1) * SEQ, :]
                 for h in range(N_HEAD)], axis=1)
             for b in range(BATCH)], axis=0)                      # [16, 32]

        # output projection + residual + LayerNorm1 (post-norm)
        attn = jnp.dot(attn, wo, preferred_element_type=jnp.float32) + bo
        y = _layer_norm(x + attn, g1, beta1)

        # feed-forward: linear2(relu(linear1(y))) + residual + LayerNorm2
        h1 = jnp.maximum(jnp.dot(y, w1, preferred_element_type=jnp.float32) + b1, 0.0)
        h2 = jnp.dot(h1, w2, preferred_element_type=jnp.float32) + b2
        x = _layer_norm(y + h2, g2, beta2)

    # ---- decoder projection ---------------------------------------------------
    dec_w = misc_ref[DEC_W_OFF:DEC_W_OFF + D_MODEL, :N_TOKEN]     # [32, 64]
    dec_b = misc_ref[DEC_B_ROW:DEC_B_ROW + 1, :N_TOKEN]           # [1, 64]
    logits = jnp.dot(x, dec_w, preferred_element_type=jnp.float32) + dec_b  # [16,64]

    # lane-dense [SEQ, BATCH*N_TOKEN] = [8, 128] slab: single unmasked store
    o_ref[...] = jnp.concatenate(
        [logits[b * SEQ:(b + 1) * SEQ, :] for b in range(BATCH)], axis=1)


# ----------------------------- pallas_call wrapper ----------------------------
def transformer_forward(src, src_mask, params):
    """src: int32 [SEQ, BATCH]; src_mask: f32 additive [SEQ, SEQ]."""
    # Combined block-diagonal (batch, head) attention mask: src_mask on each
    # diagonal SEQ x SEQ block, -1e9 on cross-block entries.  Built in the
    # wrapper because it only depends on the (per-call constant) src_mask.
    blk = jnp.arange(BH * SEQ) // SEQ
    same = blk[:, None] == blk[None, :]
    mask_big = jnp.where(same,
                         jnp.tile(src_mask.astype(jnp.float32), (BH, BH)),
                         jnp.float32(-1e9))

    out = pl.pallas_call(
        fused_forward_kernel,
        out_shape=jax.ShapeDtypeStruct((SEQ, BATCH * N_TOKEN), jnp.float32),
        in_specs=[_vmem_spec()] * 6,
        out_specs=_vmem_spec(),
        cost_estimate=pl.CostEstimate(flops=1_380_000,
                                      transcendentals=2_200,
                                      bytes_accessed=310_000),
    )(src, params['embedding'], params['pe'], mask_big,
      params['qkv_slab'], params['misc_slab'])

    # [SEQ, BATCH*N_TOKEN] -> [SEQ, BATCH, N_TOKEN]
    return out.reshape(SEQ, BATCH, N_TOKEN)


# ----------------------------- parameters ------------------------------------
def make_positional_encoding():
    position = jnp.arange(SEQ, dtype=jnp.float32)[:, None]
    div_term = jnp.exp(jnp.arange(0, D_MODEL, 2, dtype=jnp.float32)
                       * (-math.log(10000.0) / D_MODEL))
    pe = jnp.zeros((SEQ, D_MODEL), jnp.float32)
    pe = pe.at[:, 0::2].set(jnp.sin(position * div_term))
    pe = pe.at[:, 1::2].set(jnp.cos(position * div_term))
    return pe


def init_params(key):
    """Random init (same scheme as before; PyTorch-default parity is not a
    kernel concern).  All per-layer parameters + the decoder are packed at init
    time into two VMEM slabs so the kernel needs only 2 parameter DMAs."""
    initrange = 0.1
    keys = jax.random.split(key, 2 + N_LAYERS)

    # sqrt(d_model) embedding scale folded into the table at init
    embedding = (jax.random.uniform(keys[0], (N_TOKEN, D_MODEL), jnp.float32,
                                    -initrange, initrange) * math.sqrt(D_MODEL))
    dec_w = jax.random.uniform(keys[1], (N_TOKEN, D_MODEL), jnp.float32,
                               -initrange, initrange)     # PyTorch [out, in]

    qkv_slab = np.zeros((QKV_ROWS, QKV_W), np.float32)
    misc_slab = np.zeros((MISC_ROWS, MISC_W), np.float32)

    for li in range(N_LAYERS):
        k = jax.random.split(keys[2 + li], 6)
        s_att = 1.0 / math.sqrt(D_MODEL)
        s_ff1 = 1.0 / math.sqrt(D_MODEL)
        s_ff2 = 1.0 / math.sqrt(D_HID)
        # PyTorch shapes W=[out,in]; stored pre-transposed to [in, out].
        wq = np.asarray(jax.random.uniform(k[0], (D_MODEL, D_MODEL), jnp.float32, -s_att, s_att)).T
        wk = np.asarray(jax.random.uniform(k[1], (D_MODEL, D_MODEL), jnp.float32, -s_att, s_att)).T
        wv = np.asarray(jax.random.uniform(k[2], (D_MODEL, D_MODEL), jnp.float32, -s_att, s_att)).T
        wo = np.asarray(jax.random.uniform(k[3], (D_MODEL, D_MODEL), jnp.float32, -s_att, s_att)).T
        w1 = np.asarray(jax.random.uniform(k[4], (D_HID, D_MODEL), jnp.float32, -s_ff1, s_ff1)).T
        w2 = np.asarray(jax.random.uniform(k[5], (D_MODEL, D_HID), jnp.float32, -s_ff2, s_ff2)).T

        q0 = li * QKV_L_ROWS
        qkv_slab[q0:q0 + D_MODEL, Q_OFF:Q_OFF + D_MODEL] = wq
        qkv_slab[q0:q0 + D_MODEL, K_OFF:K_OFF + D_MODEL] = wk
        qkv_slab[q0:q0 + D_MODEL, V_OFF:V_OFF + D_MODEL] = wv
        # bqkv row (q0 + D_MODEL) stays zero (bias init = 0)

        m0 = li * MISC_L_ROWS
        misc_slab[m0 + WO_OFF:m0 + WO_OFF + D_MODEL, :D_MODEL] = wo
        misc_slab[m0 + W1_OFF:m0 + W1_OFF + D_MODEL, :D_HID] = w1
        misc_slab[m0 + W2_OFF:m0 + W2_OFF + D_HID, :D_MODEL] = w2
        # vector rows: bo=0, g1=1, beta1=2, g2=3, beta2=4, b1=5, b2=6
        misc_slab[m0 + VEC_OFF + 1, :D_MODEL] = 1.0   # LayerNorm1 gamma
        misc_slab[m0 + VEC_OFF + 3, :D_MODEL] = 1.0   # LayerNorm2 gamma

    misc_slab[DEC_W_OFF:DEC_W_OFF + D_MODEL, :N_TOKEN] = np.asarray(dec_w).T
    # decoder bias row stays zero

    pe_tiled = jnp.tile(make_positional_encoding(), (BATCH, 1))   # [B*S, D]

    return {
        'embedding': embedding,
        'pe': pe_tiled,
        'qkv_slab': jnp.asarray(qkv_slab),
        'misc_slab': jnp.asarray(misc_slab),
    }


# ----------------------------- main -------------------------------------------
if __name__ == "__main__":
    key = jax.random.PRNGKey(0)
    pkey, skey = jax.random.split(key)
    params = init_params(pkey)

    src = jax.random.randint(skey, (SEQ, BATCH), 0, N_TOKEN, dtype=jnp.int32)
    # causal additive mask (0 on/below diag, large negative above)
    src_mask = jnp.triu(jnp.full((SEQ, SEQ), -1e9, jnp.float32), k=1)

    out = jax.jit(transformer_forward)(src, src_mask, params)
    out = jax.block_until_ready(out)

    assert out.shape == (SEQ, BATCH, N_TOKEN)
    assert bool(jnp.all(jnp.isfinite(out)))
    print("KERNEL_OK")
</pallas_src>

<mosaic_0001>
module attributes {stable_mosaic.version = 11 : i64} {
  func.func @fused_forward_kernel(%arg0: memref<8x2xi32, #tpu.memory_space<vmem>>, %arg1: memref<64x32xf32, #tpu.memory_space<vmem>>, %arg2: memref<16x32xf32, #tpu.memory_space<vmem>>, %arg3: memref<32x32xf32, #tpu.memory_space<vmem>>, %arg4: memref<80x384xf32, #tpu.memory_space<vmem>>, %arg5: memref<312x128xf32, #tpu.memory_space<vmem>>, %arg6: memref<8x128xf32, #tpu.memory_space<vmem>>) attributes {dimension_semantics = [], scalar_prefetch = 0 : i64, scratch_operands = 0 : i64, tpu.core_type = #tpu.core_type<tc>} {
    %c0 = arith.constant 0 : index
    %c0_0 = arith.constant 0 : index
    %0 = vector.load %arg0[%c0, %c0_0] : memref<8x2xi32, #tpu.memory_space<vmem>>, vector<8x2xi32>
    %1 = tpu.iota {dimensions = array<i32: 1>} : vector<8x64xi32>
    %2 = vector.extract_strided_slice %0 {offsets = [0, 0], sizes = [8, 1], strides = [1, 1]} : vector<8x2xi32> to vector<8x1xi32>
    %3 = vector.broadcast %2 : vector<8x1xi32> to vector<8x64xi32>
    %4 = arith.cmpi eq, %1, %3 : vector<8x64xi32>
    %5 = arith.extui %4 : vector<8x64xi1> to vector<8x64xi32>
    %6 = arith.sitofp %5 : vector<8x64xi32> to vector<8x64xf32>
    %7 = vector.extract_strided_slice %0 {offsets = [0, 1], sizes = [8, 1], strides = [1, 1]} : vector<8x2xi32> to vector<8x1xi32>
    %8 = vector.broadcast %7 : vector<8x1xi32> to vector<8x64xi32>
    %9 = arith.cmpi eq, %1, %8 : vector<8x64xi32>
    %10 = arith.extui %9 : vector<8x64xi1> to vector<8x64xi32>
    %11 = arith.sitofp %10 : vector<8x64xi32> to vector<8x64xf32>
    %12 = tpu.concatenate %6, %11 in 0 : vector<8x64xf32>, vector<8x64xf32> -> vector<16x64xf32>
    %c0_1 = arith.constant 0 : index
    %c0_2 = arith.constant 0 : index
    %13 = vector.load %arg1[%c0_1, %c0_2] : memref<64x32xf32, #tpu.memory_space<vmem>>, vector<64x32xf32>
    %cst = arith.constant dense<0.000000e+00> : vector<16x32xf32>
    %14 = tpu.matmul %12, %13, %cst {dimension_numbers = #tpu.dot_dimension_numbers<[1], [0], [0], [1], [0, 0, 1, 1], [], []>} : vector<16x64xf32>, vector<64x32xf32>, vector<16x32xf32> -> vector<16x32xf32>
    %c0_3 = arith.constant 0 : index
    %c0_4 = arith.constant 0 : index
    %15 = vector.load %arg2[%c0_3, %c0_4] : memref<16x32xf32, #tpu.memory_space<vmem>>, vector<16x32xf32>
    %16 = arith.addf %14, %15 : vector<16x32xf32>
    %c0_5 = arith.constant 0 : index
    %c0_6 = arith.constant 0 : index
    %17 = vector.load %arg3[%c0_5, %c0_6] : memref<32x32xf32, #tpu.memory_space<vmem>>, vector<32x32xf32>
    %c0_7 = arith.constant 0 : index
    %c0_8 = arith.constant 0 : index
    %18 = vector.load %arg4[%c0_7, %c0_8] : memref<80x384xf32, #tpu.memory_space<vmem>>, vector<32x384xf32>
    %c32 = arith.constant 32 : index
    %c0_9 = arith.constant 0 : index
    %19 = vector.load %arg4[%c32, %c0_9] : memref<80x384xf32, #tpu.memory_space<vmem>>, vector<1x384xf32>
    %c0_10 = arith.constant 0 : index
    %c0_11 = arith.constant 0 : index
    %20 = vector.load %arg5[%c0_10, %c0_11] : memref<312x128xf32, #tpu.memory_space<vmem>>, vector<32x32xf32>
    %c32_12 = arith.constant 32 : index
    %c0_13 = arith.constant 0 : index
    %21 = vector.load %arg5[%c32_12, %c0_13] : memref<312x128xf32, #tpu.memory_space<vmem>>, vector<32x64xf32>
    %c64 = arith.constant 64 : index
    %c0_14 = arith.constant 0 : index
    %22 = vector.load %arg5[%c64, %c0_14] : memref<312x128xf32, #tpu.memory_space<vmem>>, vector<64x32xf32>
    %c128 = arith.constant 128 : index
    %c0_15 = arith.constant 0 : index
    %23 = vector.load %arg5[%c128, %c0_15] : memref<312x128xf32, #tpu.memory_space<vmem>>, vector<8x128xf32>
    %24 = vector.extract_strided_slice %23 {offsets = [0, 0], sizes = [1, 32], strides = [1, 1]} : vector<8x128xf32> to vector<1x32xf32>
    %25 = vector.extract_strided_slice %23 {offsets = [1, 0], sizes = [1, 32], strides = [1, 1]} : vector<8x128xf32> to vector<1x32xf32>
    %26 = vector.extract_strided_slice %23 {offsets = [2, 0], sizes = [1, 32], strides = [1, 1]} : vector<8x128xf32> to vector<1x32xf32>
    %27 = vector.extract_strided_slice %23 {offsets = [3, 0], sizes = [1, 32], strides = [1, 1]} : vector<8x128xf32> to vector<1x32xf32>
    %28 = vector.extract_strided_slice %23 {offsets = [4, 0], sizes = [1, 32], strides = [1, 1]} : vector<8x128xf32> to vector<1x32xf32>
    %29 = vector.extract_strided_slice %23 {offsets = [5, 0], sizes = [1, 64], strides = [1, 1]} : vector<8x128xf32> to vector<1x64xf32>
    %30 = vector.extract_strided_slice %23 {offsets = [6, 0], sizes = [1, 32], strides = [1, 1]} : vector<8x128xf32> to vector<1x32xf32>
    %cst_16 = arith.constant dense<0.000000e+00> : vector<16x384xf32>
    %31 = tpu.matmul %16, %18, %cst_16 {dimension_numbers = #tpu.dot_dimension_numbers<[1], [0], [0], [1], [0, 0, 1, 1], [], []>} : vector<16x32xf32>, vector<32x384xf32>, vector<16x384xf32> -> vector<16x384xf32>
    %32 = vector.broadcast %19 : vector<1x384xf32> to vector<16x384xf32>
    %33 = arith.addf %31, %32 : vector<16x384xf32>
    %34 = vector.extract_strided_slice %33 {offsets = [0, 0], sizes = [8, 16], strides = [1, 1]} : vector<16x384xf32> to vector<8x16xf32>
    %35 = vector.extract_strided_slice %33 {offsets = [0, 16], sizes = [8, 16], strides = [1, 1]} : vector<16x384xf32> to vector<8x16xf32>
    %36 = vector.extract_strided_slice %33 {offsets = [8, 0], sizes = [8, 16], strides = [1, 1]} : vector<16x384xf32> to vector<8x16xf32>
    %37 = vector.extract_strided_slice %33 {offsets = [8, 16], sizes = [8, 16], strides = [1, 1]} : vector<16x384xf32> to vector<8x16xf32>
    %38 = tpu.concatenate %34, %35, %36, %37 in 0 : vector<8x16xf32>, vector<8x16xf32>, vector<8x16xf32>, vector<8x16xf32> -> vector<32x16xf32>
    %39 = vector.extract_strided_slice %33 {offsets = [0, 128], sizes = [8, 16], strides = [1, 1]} : vector<16x384xf32> to vector<8x16xf32>
    %40 = vector.extract_strided_slice %33 {offsets = [0, 144], sizes = [8, 16], strides = [1, 1]} : vector<16x384xf32> to vector<8x16xf32>
    %41 = vector.extract_strided_slice %33 {offsets = [8, 128], sizes = [8, 16], strides = [1, 1]} : vector<16x384xf32> to vector<8x16xf32>
    %42 = vector.extract_strided_slice %33 {offsets = [8, 144], sizes = [8, 16], strides = [1, 1]} : vector<16x384xf32> to vector<8x16xf32>
    %43 = tpu.concatenate %39, %40, %41, %42 in 0 : vector<8x16xf32>, vector<8x16xf32>, vector<8x16xf32>, vector<8x16xf32> -> vector<32x16xf32>
    %44 = vector.extract_strided_slice %33 {offsets = [0, 256], sizes = [8, 16], strides = [1, 1]} : vector<16x384xf32> to vector<8x16xf32>
    %45 = vector.extract_strided_slice %33 {offsets = [0, 272], sizes = [8, 16], strides = [1, 1]} : vector<16x384xf32> to vector<8x16xf32>
    %46 = vector.extract_strided_slice %33 {offsets = [8, 256], sizes = [8, 16], strides = [1, 1]} : vector<16x384xf32> to vector<8x16xf32>
    %47 = vector.extract_strided_slice %33 {offsets = [8, 272], sizes = [8, 16], strides = [1, 1]} : vector<16x384xf32> to vector<8x16xf32>
    %48 = tpu.concatenate %44, %45, %46, %47 in 0 : vector<8x16xf32>, vector<8x16xf32>, vector<8x16xf32>, vector<8x16xf32> -> vector<32x16xf32>
    %cst_17 = arith.constant dense<0.000000e+00> : vector<32x32xf32>
    %49 = tpu.matmul %38, %43, %cst_17 {dimension_numbers = #tpu.dot_dimension_numbers<[1], [1], [0], [0], [0, 0, 1, 0], [], []>} : vector<32x16xf32>, vector<32x16xf32>, vector<32x32xf32> -> vector<32x32xf32>
    %cst_18 = arith.constant 2.500000e-01 : f32
    %50 = vector.broadcast %cst_18 : f32 to vector<32x32xf32>
    %51 = arith.mulf %49, %50 : vector<32x32xf32>
    %52 = arith.addf %51, %17 : vector<32x32xf32>
    %cst_19 = arith.constant dense<0xFF800000> : vector<32xf32>
    %53 = vector.multi_reduction <maximumf>, %52, %cst_19 [1] : vector<32x32xf32> to vector<32xf32>
    %54 = vector.shape_cast %53 : vector<32xf32> to vector<32x1xf32>
    %55 = vector.broadcast %54 : vector<32x1xf32> to vector<32x32xf32>
    %56 = arith.subf %52, %55 : vector<32x32xf32>
    %57 = math.exp %56 : vector<32x32xf32>
    %cst_20 = arith.constant dense<0.000000e+00> : vector<32xf32>
    %58 = vector.multi_reduction <add>, %57, %cst_20 [1] : vector<32x32xf32> to vector<32xf32>
    %59 = vector.shape_cast %58 : vector<32xf32> to vector<32x1xf32>
    %60 = vector.broadcast %59 : vector<32x1xf32> to vector<32x32xf32>
    %61 = arith.divf %57, %60 : vector<32x32xf32>
    %cst_21 = arith.constant dense<0.000000e+00> : vector<32x16xf32>
    %62 = tpu.matmul %61, %48, %cst_21 {dimension_numbers = #tpu.dot_dimension_numbers<[1], [0], [0], [1], [0, 0, 1, 1], [], []>} : vector<32x32xf32>, vector<32x16xf32>, vector<32x16xf32> -> vector<32x16xf32>
    %63 = vector.extract_strided_slice %62 {offsets = [0, 0], sizes = [8, 16], strides = [1, 1]} : vector<32x16xf32> to vector<8x16xf32>
    %64 = vector.extract_strided_slice %62 {offsets = [8, 0], sizes = [8, 16], strides = [1, 1]} : vector<32x16xf32> to vector<8x16xf32>
    %65 = tpu.concatenate %63, %64 in 1 : vector<8x16xf32>, vector<8x16xf32> -> vector<8x32xf32>
    %66 = vector.extract_strided_slice %62 {offsets = [16, 0], sizes = [8, 16], strides = [1, 1]} : vector<32x16xf32> to vector<8x16xf32>
    %67 = vector.extract_strided_slice %62 {offsets = [24, 0], sizes = [8, 16], strides = [1, 1]} : vector<32x16xf32> to vector<8x16xf32>
    %68 = tpu.concatenate %66, %67 in 1 : vector<8x16xf32>, vector<8x16xf32> -> vector<8x32xf32>
    %69 = tpu.concatenate %65, %68 in 0 : vector<8x32xf32>, vector<8x32xf32> -> vector<16x32xf32>
    %cst_22 = arith.constant dense<0.000000e+00> : vector<16x32xf32>
    %70 = tpu.matmul %69, %20, %cst_22 {dimension_numbers = #tpu.dot_dimension_numbers<[1], [0], [0], [1], [0, 0, 1, 1], [], []>} : vector<16x32xf32>, vector<32x32xf32>, vector<16x32xf32> -> vector<16x32xf32>
    %71 = vector.broadcast %24 : vector<1x32xf32> to vector<16x32xf32>
    %72 = arith.addf %70, %71 : vector<16x32xf32>
    %73 = arith.addf %16, %72 : vector<16x32xf32>
    %cst_23 = arith.constant dense<0.000000e+00> : vector<16xf32>
    %74 = vector.multi_reduction <add>, %73, %cst_23 [1] : vector<16x32xf32> to vector<16xf32>
    %75 = vector.shape_cast %74 : vector<16xf32> to vector<16x1xf32>
    %cst_24 = arith.constant 3.200000e+01 : f32
    %76 = vector.broadcast %cst_24 : f32 to vector<16x1xf32>
    %77 = arith.divf %75, %76 : vector<16x1xf32>
    %78 = vector.broadcast %77 : vector<16x1xf32> to vector<16x32xf32>
    %79 = arith.subf %73, %78 : vector<16x32xf32>
    %80 = arith.mulf %79, %79 : vector<16x32xf32>
    %cst_25 = arith.constant dense<0.000000e+00> : vector<16xf32>
    %81 = vector.multi_reduction <add>, %80, %cst_25 [1] : vector<16x32xf32> to vector<16xf32>
    %82 = vector.shape_cast %81 : vector<16xf32> to vector<16x1xf32>
    %cst_26 = arith.constant 3.200000e+01 : f32
    %83 = vector.broadcast %cst_26 : f32 to vector<16x1xf32>
    %84 = arith.divf %82, %83 : vector<16x1xf32>
    %cst_27 = arith.constant 9.99999974E-6 : f32
    %85 = vector.broadcast %cst_27 : f32 to vector<16x1xf32>
    %86 = arith.addf %84, %85 : vector<16x1xf32>
    %87 = math.rsqrt %86 : vector<16x1xf32>
    %88 = vector.broadcast %87 : vector<16x1xf32> to vector<16x32xf32>
    %89 = arith.mulf %79, %88 : vector<16x32xf32>
    %90 = vector.broadcast %25 : vector<1x32xf32> to vector<16x32xf32>
    %91 = arith.mulf %89, %90 : vector<16x32xf32>
    %92 = vector.broadcast %26 : vector<1x32xf32> to vector<16x32xf32>
    %93 = arith.addf %91, %92 : vector<16x32xf32>
    %cst_28 = arith.constant dense<0.000000e+00> : vector<16x64xf32>
    %94 = tpu.matmul %93, %21, %cst_28 {dimension_numbers = #tpu.dot_dimension_numbers<[1], [0], [0], [1], [0, 0, 1, 1], [], []>} : vector<16x32xf32>, vector<32x64xf32>, vector<16x64xf32> -> vector<16x64xf32>
    %95 = vector.broadcast %29 : vector<1x64xf32> to vector<16x64xf32>
    %96 = arith.addf %94, %95 : vector<16x64xf32>
    %cst_29 = arith.constant 0.000000e+00 : f32
    %97 = vector.broadcast %cst_29 : f32 to vector<16x64xf32>
    %98 = arith.maximumf %96, %97 : vector<16x64xf32>
    %cst_30 = arith.constant dense<0.000000e+00> : vector<16x32xf32>
    %99 = tpu.matmul %98, %22, %cst_30 {dimension_numbers = #tpu.dot_dimension_numbers<[1], [0], [0], [1], [0, 0, 1, 1], [], []>} : vector<16x64xf32>, vector<64x32xf32>, vector<16x32xf32> -> vector<16x32xf32>
    %100 = vector.broadcast %30 : vector<1x32xf32> to vector<16x32xf32>
    %101 = arith.addf %99, %100 : vector<16x32xf32>
    %102 = arith.addf %93, %101 : vector<16x32xf32>
    %cst_31 = arith.constant dense<0.000000e+00> : vector<16xf32>
    %103 = vector.multi_reduction <add>, %102, %cst_31 [1] : vector<16x32xf32> to vector<16xf32>
    %104 = vector.shape_cast %103 : vector<16xf32> to vector<16x1xf32>
    %cst_32 = arith.constant 3.200000e+01 : f32
    %105 = vector.broadcast %cst_32 : f32 to vector<16x1xf32>
    %106 = arith.divf %104, %105 : vector<16x1xf32>
    %107 = vector.broadcast %106 : vector<16x1xf32> to vector<16x32xf32>
    %108 = arith.subf %102, %107 : vector<16x32xf32>
    %109 = arith.mulf %108, %108 : vector<16x32xf32>
    %cst_33 = arith.constant dense<0.000000e+00> : vector<16xf32>
    %110 = vector.multi_reduction <add>, %109, %cst_33 [1] : vector<16x32xf32> to vector<16xf32>
    %111 = vector.shape_cast %110 : vector<16xf32> to vector<16x1xf32>
    %cst_34 = arith.constant 3.200000e+01 : f32
    %112 = vector.broadcast %cst_34 : f32 to vector<16x1xf32>
    %113 = arith.divf %111, %112 : vector<16x1xf32>
    %cst_35 = arith.constant 9.99999974E-6 : f32
    %114 = vector.broadcast %cst_35 : f32 to vector<16x1xf32>
    %115 = arith.addf %113, %114 : vector<16x1xf32>
    %116 = math.rsqrt %115 : vector<16x1xf32>
    %117 = vector.broadcast %116 : vector<16x1xf32> to vector<16x32xf32>
    %118 = arith.mulf %108, %117 : vector<16x32xf32>
    %119 = vector.broadcast %27 : vector<1x32xf32> to vector<16x32xf32>
    %120 = arith.mulf %118, %119 : vector<16x32xf32>
    %121 = vector.broadcast %28 : vector<1x32xf32> to vector<16x32xf32>
    %122 = arith.addf %120, %121 : vector<16x32xf32>
    %c40 = arith.constant 40 : index
    %c0_36 = arith.constant 0 : index
    %123 = vector.load %arg4[%c40, %c0_36] : memref<80x384xf32, #tpu.memory_space<vmem>>, vector<32x384xf32>
    %c72 = arith.constant 72 : index
    %c0_37 = arith.constant 0 : index
    %124 = vector.load %arg4[%c72, %c0_37] : memref<80x384xf32, #tpu.memory_space<vmem>>, vector<1x384xf32>
    %c136 = arith.constant 136 : index
    %c0_38 = arith.constant 0 : index
    %125 = vector.load %arg5[%c136, %c0_38] : memref<312x128xf32, #tpu.memory_space<vmem>>, vector<32x32xf32>
    %c168 = arith.constant 168 : index
    %c0_39 = arith.constant 0 : index
    %126 = vector.load %arg5[%c168, %c0_39] : memref<312x128xf32, #tpu.memory_space<vmem>>, vector<32x64xf32>
    %c200 = arith.constant 200 : index
    %c0_40 = arith.constant 0 : index
    %127 = vector.load %arg5[%c200, %c0_40] : memref<312x128xf32, #tpu.memory_space<vmem>>, vector<64x32xf32>
    %c264 = arith.constant 264 : index
    %c0_41 = arith.constant 0 : index
    %128 = vector.load %arg5[%c264, %c0_41] : memref<312x128xf32, #tpu.memory_space<vmem>>, vector<8x128xf32>
    %129 = vector.extract_strided_slice %128 {offsets = [0, 0], sizes = [1, 32], strides = [1, 1]} : vector<8x128xf32> to vector<1x32xf32>
    %130 = vector.extract_strided_slice %128 {offsets = [1, 0], sizes = [1, 32], strides = [1, 1]} : vector<8x128xf32> to vector<1x32xf32>
    %131 = vector.extract_strided_slice %128 {offsets = [2, 0], sizes = [1, 32], strides = [1, 1]} : vector<8x128xf32> to vector<1x32xf32>
    %132 = vector.extract_strided_slice %128 {offsets = [3, 0], sizes = [1, 32], strides = [1, 1]} : vector<8x128xf32> to vector<1x32xf32>
    %133 = vector.extract_strided_slice %128 {offsets = [4, 0], sizes = [1, 32], strides = [1, 1]} : vector<8x128xf32> to vector<1x32xf32>
    %134 = vector.extract_strided_slice %128 {offsets = [5, 0], sizes = [1, 64], strides = [1, 1]} : vector<8x128xf32> to vector<1x64xf32>
    %135 = vector.extract_strided_slice %128 {offsets = [6, 0], sizes = [1, 32], strides = [1, 1]} : vector<8x128xf32> to vector<1x32xf32>
    %cst_42 = arith.constant dense<0.000000e+00> : vector<16x384xf32>
    %136 = tpu.matmul %122, %123, %cst_42 {dimension_numbers = #tpu.dot_dimension_numbers<[1], [0], [0], [1], [0, 0, 1, 1], [], []>} : vector<16x32xf32>, vector<32x384xf32>, vector<16x384xf32> -> vector<16x384xf32>
    %137 = vector.broadcast %124 : vector<1x384xf32> to vector<16x384xf32>
    %138 = arith.addf %136, %137 : vector<16x384xf32>
    %139 = vector.extract_strided_slice %138 {offsets = [0, 0], sizes = [8, 16], strides = [1, 1]} : vector<16x384xf32> to vector<8x16xf32>
    %140 = vector.extract_strided_slice %138 {offsets = [0, 16], sizes = [8, 16], strides = [1, 1]} : vector<16x384xf32> to vector<8x16xf32>
    %141 = vector.extract_strided_slice %138 {offsets = [8, 0], sizes = [8, 16], strides = [1, 1]} : vector<16x384xf32> to vector<8x16xf32>
    %142 = vector.extract_strided_slice %138 {offsets = [8, 16], sizes = [8, 16], strides = [1, 1]} : vector<16x384xf32> to vector<8x16xf32>
    %143 = tpu.concatenate %139, %140, %141, %142 in 0 : vector<8x16xf32>, vector<8x16xf32>, vector<8x16xf32>, vector<8x16xf32> -> vector<32x16xf32>
    %144 = vector.extract_strided_slice %138 {offsets = [0, 128], sizes = [8, 16], strides = [1, 1]} : vector<16x384xf32> to vector<8x16xf32>
    %145 = vector.extract_strided_slice %138 {offsets = [0, 144], sizes = [8, 16], strides = [1, 1]} : vector<16x384xf32> to vector<8x16xf32>
    %146 = vector.extract_strided_slice %138 {offsets = [8, 128], sizes = [8, 16], strides = [1, 1]} : vector<16x384xf32> to vector<8x16xf32>
    %147 = vector.extract_strided_slice %138 {offsets = [8, 144], sizes = [8, 16], strides = [1, 1]} : vector<16x384xf32> to vector<8x16xf32>
    %148 = tpu.concatenate %144, %145, %146, %147 in 0 : vector<8x16xf32>, vector<8x16xf32>, vector<8x16xf32>, vector<8x16xf32> -> vector<32x16xf32>
    %149 = vector.extract_strided_slice %138 {offsets = [0, 256], sizes = [8, 16], strides = [1, 1]} : vector<16x384xf32> to vector<8x16xf32>
    %150 = vector.extract_strided_slice %138 {offsets = [0, 272], sizes = [8, 16], strides = [1, 1]} : vector<16x384xf32> to vector<8x16xf32>
    %151 = vector.extract_strided_slice %138 {offsets = [8, 256], sizes = [8, 16], strides = [1, 1]} : vector<16x384xf32> to vector<8x16xf32>
    %152 = vector.extract_strided_slice %138 {offsets = [8, 272], sizes = [8, 16], strides = [1, 1]} : vector<16x384xf32> to vector<8x16xf32>
    %153 = tpu.concatenate %149, %150, %151, %152 in 0 : vector<8x16xf32>, vector<8x16xf32>, vector<8x16xf32>, vector<8x16xf32> -> vector<32x16xf32>
    %cst_43 = arith.constant dense<0.000000e+00> : vector<32x32xf32>
    %154 = tpu.matmul %143, %148, %cst_43 {dimension_numbers = #tpu.dot_dimension_numbers<[1], [1], [0], [0], [0, 0, 1, 0], [], []>} : vector<32x16xf32>, vector<32x16xf32>, vector<32x32xf32> -> vector<32x32xf32>
    %cst_44 = arith.constant 2.500000e-01 : f32
    %155 = vector.broadcast %cst_44 : f32 to vector<32x32xf32>
    %156 = arith.mulf %154, %155 : vector<32x32xf32>
    %157 = arith.addf %156, %17 : vector<32x32xf32>
    %cst_45 = arith.constant dense<0xFF800000> : vector<32xf32>
    %158 = vector.multi_reduction <maximumf>, %157, %cst_45 [1] : vector<32x32xf32> to vector<32xf32>
    %159 = vector.shape_cast %158 : vector<32xf32> to vector<32x1xf32>
    %160 = vector.broadcast %159 : vector<32x1xf32> to vector<32x32xf32>
    %161 = arith.subf %157, %160 : vector<32x32xf32>
    %162 = math.exp %161 : vector<32x32xf32>
    %cst_46 = arith.constant dense<0.000000e+00> : vector<32xf32>
    %163 = vector.multi_reduction <add>, %162, %cst_46 [1] : vector<32x32xf32> to vector<32xf32>
    %164 = vector.shape_cast %163 : vector<32xf32> to vector<32x1xf32>
    %165 = vector.broadcast %164 : vector<32x1xf32> to vector<32x32xf32>
    %166 = arith.divf %162, %165 : vector<32x32xf32>
    %cst_47 = arith.constant dense<0.000000e+00> : vector<32x16xf32>
    %167 = tpu.matmul %166, %153, %cst_47 {dimension_numbers = #tpu.dot_dimension_numbers<[1], [0], [0], [1], [0, 0, 1, 1], [], []>} : vector<32x32xf32>, vector<32x16xf32>, vector<32x16xf32> -> vector<32x16xf32>
    %168 = vector.extract_strided_slice %167 {offsets = [0, 0], sizes = [8, 16], strides = [1, 1]} : vector<32x16xf32> to vector<8x16xf32>
    %169 = vector.extract_strided_slice %167 {offsets = [8, 0], sizes = [8, 16], strides = [1, 1]} : vector<32x16xf32> to vector<8x16xf32>
    %170 = tpu.concatenate %168, %169 in 1 : vector<8x16xf32>, vector<8x16xf32> -> vector<8x32xf32>
    %171 = vector.extract_strided_slice %167 {offsets = [16, 0], sizes = [8, 16], strides = [1, 1]} : vector<32x16xf32> to vector<8x16xf32>
    %172 = vector.extract_strided_slice %167 {offsets = [24, 0], sizes = [8, 16], strides = [1, 1]} : vector<32x16xf32> to vector<8x16xf32>
    %173 = tpu.concatenate %171, %172 in 1 : vector<8x16xf32>, vector<8x16xf32> -> vector<8x32xf32>
    %174 = tpu.concatenate %170, %173 in 0 : vector<8x32xf32>, vector<8x32xf32> -> vector<16x32xf32>
    %cst_48 = arith.constant dense<0.000000e+00> : vector<16x32xf32>
    %175 = tpu.matmul %174, %125, %cst_48 {dimension_numbers = #tpu.dot_dimension_numbers<[1], [0], [0], [1], [0, 0, 1, 1], [], []>} : vector<16x32xf32>, vector<32x32xf32>, vector<16x32xf32> -> vector<16x32xf32>
    %176 = vector.broadcast %129 : vector<1x32xf32> to vector<16x32xf32>
    %177 = arith.addf %175, %176 : vector<16x32xf32>
    %178 = arith.addf %122, %177 : vector<16x32xf32>
    %cst_49 = arith.constant dense<0.000000e+00> : vector<16xf32>
    %179 = vector.multi_reduction <add>, %178, %cst_49 [1] : vector<16x32xf32> to vector<16xf32>
    %180 = vector.shape_cast %179 : vector<16xf32> to vector<16x1xf32>
    %cst_50 = arith.constant 3.200000e+01 : f32
    %181 = vector.broadcast %cst_50 : f32 to vector<16x1xf32>
    %182 = arith.divf %180, %181 : vector<16x1xf32>
    %183 = vector.broadcast %182 : vector<16x1xf32> to vector<16x32xf32>
    %184 = arith.subf %178, %183 : vector<16x32xf32>
    %185 = arith.mulf %184, %184 : vector<16x32xf32>
    %cst_51 = arith.constant dense<0.000000e+00> : vector<16xf32>
    %186 = vector.multi_reduction <add>, %185, %cst_51 [1] : vector<16x32xf32> to vector<16xf32>
    %187 = vector.shape_cast %186 : vector<16xf32> to vector<16x1xf32>
    %cst_52 = arith.constant 3.200000e+01 : f32
    %188 = vector.broadcast %cst_52 : f32 to vector<16x1xf32>
    %189 = arith.divf %187, %188 : vector<16x1xf32>
    %cst_53 = arith.constant 9.99999974E-6 : f32
    %190 = vector.broadcast %cst_53 : f32 to vector<16x1xf32>
    %191 = arith.addf %189, %190 : vector<16x1xf32>
    %192 = math.rsqrt %191 : vector<16x1xf32>
    %193 = vector.broadcast %192 : vector<16x1xf32> to vector<16x32xf32>
    %194 = arith.mulf %184, %193 : vector<16x32xf32>
    %195 = vector.broadcast %130 : vector<1x32xf32> to vector<16x32xf32>
    %196 = arith.mulf %194, %195 : vector<16x32xf32>
    %197 = vector.broadcast %131 : vector<1x32xf32> to vector<16x32xf32>
    %198 = arith.addf %196, %197 : vector<16x32xf32>
    %cst_54 = arith.constant dense<0.000000e+00> : vector<16x64xf32>
    %199 = tpu.matmul %198, %126, %cst_54 {dimension_numbers = #tpu.dot_dimension_numbers<[1], [0], [0], [1], [0, 0, 1, 1], [], []>} : vector<16x32xf32>, vector<32x64xf32>, vector<16x64xf32> -> vector<16x64xf32>
    %200 = vector.broadcast %134 : vector<1x64xf32> to vector<16x64xf32>
    %201 = arith.addf %199, %200 : vector<16x64xf32>
    %cst_55 = arith.constant 0.000000e+00 : f32
    %202 = vector.broadcast %cst_55 : f32 to vector<16x64xf32>
    %203 = arith.maximumf %201, %202 : vector<16x64xf32>
    %cst_56 = arith.constant dense<0.000000e+00> : vector<16x32xf32>
    %204 = tpu.matmul %203, %127, %cst_56 {dimension_numbers = #tpu.dot_dimension_numbers<[1], [0], [0], [1], [0, 0, 1, 1], [], []>} : vector<16x64xf32>, vector<64x32xf32>, vector<16x32xf32> -> vector<16x32xf32>
    %205 = vector.broadcast %135 : vector<1x32xf32> to vector<16x32xf32>
    %206 = arith.addf %204, %205 : vector<16x32xf32>
    %207 = arith.addf %198, %206 : vector<16x32xf32>
    %cst_57 = arith.constant dense<0.000000e+00> : vector<16xf32>
    %208 = vector.multi_reduction <add>, %207, %cst_57 [1] : vector<16x32xf32> to vector<16xf32>
    %209 = vector.shape_cast %208 : vector<16xf32> to vector<16x1xf32>
    %cst_58 = arith.constant 3.200000e+01 : f32
    %210 = vector.broadcast %cst_58 : f32 to vector<16x1xf32>
    %211 = arith.divf %209, %210 : vector<16x1xf32>
    %212 = vector.broadcast %211 : vector<16x1xf32> to vector<16x32xf32>
    %213 = arith.subf %207, %212 : vector<16x32xf32>
    %214 = arith.mulf %213, %213 : vector<16x32xf32>
    %cst_59 = arith.constant dense<0.000000e+00> : vector<16xf32>
    %215 = vector.multi_reduction <add>, %214, %cst_59 [1] : vector<16x32xf32> to vector<16xf32>
    %216 = vector.shape_cast %215 : vector<16xf32> to vector<16x1xf32>
    %cst_60 = arith.constant 3.200000e+01 : f32
    %217 = vector.broadcast %cst_60 : f32 to vector<16x1xf32>
    %218 = arith.divf %216, %217 : vector<16x1xf32>
    %cst_61 = arith.constant 9.99999974E-6 : f32
    %219 = vector.broadcast %cst_61 : f32 to vector<16x1xf32>
    %220 = arith.addf %218, %219 : vector<16x1xf32>
    %221 = math.rsqrt %220 : vector<16x1xf32>
    %222 = vector.broadcast %221 : vector<16x1xf32> to vector<16x32xf32>
    %223 = arith.mulf %213, %222 : vector<16x32xf32>
    %224 = vector.broadcast %132 : vector<1x32xf32> to vector<16x32xf32>
    %225 = arith.mulf %223, %224 : vector<16x32xf32>
    %226 = vector.broadcast %133 : vector<1x32xf32> to vector<16x32xf32>
    %227 = arith.addf %225, %226 : vector<16x32xf32>
    %c272 = arith.constant 272 : index
    %c0_62 = arith.constant 0 : index
    %228 = vector.load %arg5[%c272, %c0_62] : memref<312x128xf32, #tpu.memory_space<vmem>>, vector<32x64xf32>
    %c304 = arith.constant 304 : index
    %c0_63 = arith.constant 0 : index
    %229 = vector.load %arg5[%c304, %c0_63] : memref<312x128xf32, #tpu.memory_space<vmem>>, vector<1x64xf32>
    %cst_64 = arith.constant dense<0.000000e+00> : vector<16x64xf32>
    %230 = tpu.matmul %227, %228, %cst_64 {dimension_numbers = #tpu.dot_dimension_numbers<[1], [0], [0], [1], [0, 0, 1, 1], [], []>} : vector<16x32xf32>, vector<32x64xf32>, vector<16x64xf32> -> vector<16x64xf32>
    %231 = vector.broadcast %229 : vector<1x64xf32> to vector<16x64xf32>
    %232 = arith.addf %230, %231 : vector<16x64xf32>
    %233 = vector.extract_strided_slice %232 {offsets = [0, 0], sizes = [8, 64], strides = [1, 1]} : vector<16x64xf32> to vector<8x64xf32>
    %234 = vector.extract_strided_slice %232 {offsets = [8, 0], sizes = [8, 64], strides = [1, 1]} : vector<16x64xf32> to vector<8x64xf32>
    %235 = tpu.concatenate %233, %234 in 1 : vector<8x64xf32>, vector<8x64xf32> -> vector<8x128xf32>
    %c0_65 = arith.constant 0 : index
    %c0_66 = arith.constant 0 : index
    %236 = vector.load %arg6[%c0_65, %c0_66] : memref<8x128xf32, #tpu.memory_space<vmem>>, vector<8x128xf32>
    tpu.vector_store %arg6[%c0_65, %c0_66], %235 {strides = array<i32>} : memref<8x128xf32, #tpu.memory_space<vmem>>, vector<8x128xf32>,
    return
  }
}

</mosaic_0001>

<bundles_post_ra>
// kernel: tile.8
= control target key start
LH: loop header
LB: loop body
LE: loop exit
PB: predicated region body
PF: predicated region fallthrough
CT: control target
= control target key end

     0   :  { %s250_s0 = inlined_call_operand.vmem [shape: f32[8,8], index: 0, kind: input, shape index: {}]   ;;  %s251_s1 = inlined_call_operand.vmem [shape: f32[4,8,4,8], index: 1, kind: output, shape index: {}]  }
   0x1   :  { %v4_v0 = vld [vmem:[%s250_s0] ss:$0 sm:$0xff]  ;;  %v85_v1 = vld [vmem:[%s250_s0 + $0x1] ss:$0 sm:$0xff]  ;;  %v90_v2 = vld [vmem:[%s250_s0 + $0x2] ss:$0 sm:$0xff] }
   0x2   :  { %5 = vst [vmem:[%s251_s1] sm:$0xf] %v4_v0  ;;  %82 = vst [vmem:[%s251_s1 + $0x20] sm:$0xf] %v4_v0  ;;  %v95_v3 = vld [vmem:[%s250_s0 + $0x3] ss:$0 sm:$0xff] }
   0x3   :  { %83 = vst [vmem:[%s251_s1 + $0x40] sm:$0xf] %v4_v0  ;;  %84 = vst [vmem:[%s251_s1 + $0x60] sm:$0xf] %v4_v0  ;;  %v100_v4 = vld [vmem:[%s250_s0 + $0x4] ss:$0 sm:$0xff] }
   0x4   :  { %86 = vst [vmem:[%s251_s1 + $0x4] sm:$0xf] %v85_v1  ;;  %87 = vst [vmem:[%s251_s1 + $0x24] sm:$0xf] %v85_v1  ;;  %v105_v5 = vld [vmem:[%s250_s0 + $0x5] ss:$0 sm:$0xff] }
   0x5   :  { %88 = vst [vmem:[%s251_s1 + $0x44] sm:$0xf] %v85_v1  ;;  %89 = vst [vmem:[%s251_s1 + $0x64] sm:$0xf] %v85_v1  ;;  %v110_v6 = vld [vmem:[%s250_s0 + $0x6] ss:$0 sm:$0xff] }
   0x6   :  { %91 = vst [vmem:[%s251_s1 + $0x8] sm:$0xf] %v90_v2  ;;  %92 = vst [vmem:[%s251_s1 + $0x28] sm:$0xf] %v90_v2  ;;  %v115_v7 = vld [vmem:[%s250_s0 + $0x7] ss:$0 sm:$0xff] }
   0x7   :  { %93 = vst [vmem:[%s251_s1 + $0x48] sm:$0xf] %v90_v2  ;;  %94 = vst [vmem:[%s251_s1 + $0x68] sm:$0xf] %v90_v2 }
   0x8   :  { %96 = vst [vmem:[%s251_s1 + $0xc] sm:$0xf] %v95_v3  ;;  %97 = vst [vmem:[%s251_s1 + $0x2c] sm:$0xf] %v95_v3 }
   0x9   :  { %98 = vst [vmem:[%s251_s1 + $0x4c] sm:$0xf] %v95_v3  ;;  %99 = vst [vmem:[%s251_s1 + $0x6c] sm:$0xf] %v95_v3 }
   0xa   :  { %101 = vst [vmem:[%s251_s1 + $0x10] sm:$0xf] %v100_v4  ;;  %102 = vst [vmem:[%s251_s1 + $0x30] sm:$0xf] %v100_v4 }
   0xb   :  { %103 = vst [vmem:[%s251_s1 + $0x50] sm:$0xf] %v100_v4  ;;  %104 = vst [vmem:[%s251_s1 + $0x70] sm:$0xf] %v100_v4 }
   0xc   :  { %106 = vst [vmem:[%s251_s1 + $0x14] sm:$0xf] %v105_v5  ;;  %107 = vst [vmem:[%s251_s1 + $0x34] sm:$0xf] %v105_v5 }
   0xd   :  { %108 = vst [vmem:[%s251_s1 + $0x54] sm:$0xf] %v105_v5  ;;  %109 = vst [vmem:[%s251_s1 + $0x74] sm:$0xf] %v105_v5 }
   0xe   :  { %111 = vst [vmem:[%s251_s1 + $0x18] sm:$0xf] %v110_v6  ;;  %112 = vst [vmem:[%s251_s1 + $0x38] sm:$0xf] %v110_v6 }
   0xf   :  { %113 = vst [vmem:[%s251_s1 + $0x58] sm:$0xf] %v110_v6  ;;  %114 = vst [vmem:[%s251_s1 + $0x78] sm:$0xf] %v110_v6 }
  0x10   :  { %116 = vst [vmem:[%s251_s1 + $0x1c] sm:$0xf] %v115_v7  ;;  %117 = vst [vmem:[%s251_s1 + $0x3c] sm:$0xf] %v115_v7 }
  0x11   :  { %118 = vst [vmem:[%s251_s1 + $0x5c] sm:$0xf] %v115_v7  ;;  %119 = vst [vmem:[%s251_s1 + $0x7c] sm:$0xf] %v115_v7 }

// kernel: tile.9
= control target key start
LH: loop header
LB: loop body
LE: loop exit
PB: predicated region body
PF: predicated region fallthrough
CT: control target
= control target key end

     0   :  { %vm162_vm0 = vcmask 1047556   ;;  %s398_s10 = smov 24   ;;  %vm164_vm1 = vcmask 64512   ;;  %s400_s21 = smov 8   ;;  %vm201_vm2 = vcmask 261312   ;;  %vm244_vm3 = vcmask 195712   ;;  %s579_s0 = inlined_call_operand.vmem [shape: f32[4,8,4,8], index: 0, kind: input, shape index: {}]   ;;  %s580_s1 = inlined_call_operand.vmem [shape: f32[32,32], index: 1, kind: output, shape index: {}]  }
   0x1   :  { %v376_v0 = vld [vmem:[%s579_s0 + $0x1c] sm:$0xf]  ;;  %v377_v1 = vld [vmem:[%s579_s0 + $0x18] sm:$0xf]  ;;  %v378_v2 = vld [vmem:[%s579_s0 + $0x14] sm:$0xf] }
   0x2   :  { %128 = vst [vmem:[#allocation0 + $0x38] sm:$0xf] %v376_v0  ;;  %133 = vst [vmem:[#allocation0 + $0x30] sm:$0xf] %v377_v1  ;;  %v379_v3 = vld [vmem:[%s579_s0 + $0x10] sm:$0xf] }
   0x3   :  { %138 = vst [vmem:[#allocation0 + $0x28] sm:$0xf] %v378_v2  ;;  %v380_v4 = vld [vmem:[%s579_s0 + $0xc] sm:$0xf]  ;;  %v381_v5 = vld [vmem:[%s579_s0 + $0x8] sm:$0xf] }
   0x4   :  { %143 = vst [vmem:[#allocation0 + $0x20] sm:$0xf] %v379_v3  ;;  %148 = vst [vmem:[#allocation0 + $0x18] sm:$0xf] %v380_v4  ;;  %v382_v6 = vld [vmem:[%s579_s0 + $0x4] sm:$0xf] }
   0x5   :  { %153 = vst [vmem:[#allocation0 + $0x10] sm:$0xf] %v381_v5  ;;  %v158_v7 = vld [vmem:[%s579_s0] sm:$0xf]  ;;  %157 = vst [vmem:[#allocation0 + $0x8] sm:$0xf] %v382_v6 }
   0x6   :  { %159 = vst [vmem:[#allocation0] sm:$0xf] %v158_v7  ;;  %v360_v8 = vld [vmem:[%s579_s0 + $0x5c] sm:$0xf]  ;;  %v361_v9 = vld [vmem:[%s579_s0 + $0x58] sm:$0xf] }
   0x7   :  { %v362_v10 = vld [vmem:[%s579_s0 + $0x54] sm:$0xf]  ;;  %48 = vst [vmem:[#allocation0 + $0xb8] sm:$0xf] %v360_v8  ;;  %53 = vst [vmem:[#allocation0 + $0xb0] sm:$0xf] %v361_v9 }
   0x8   :  { %58 = vst [vmem:[#allocation0 + $0xa8] sm:$0xf] %v362_v10  ;;  %v363_v11 = vld [vmem:[%s579_s0 + $0x50] sm:$0xf]  ;;  %v364_v12 = vld [vmem:[%s579_s0 + $0x4c] sm:$0xf] }
   0x9   :  { %v365_v13 = vld [vmem:[%s579_s0 + $0x48] sm:$0xf]  ;;  %63 = vst [vmem:[#allocation0 + $0xa0] sm:$0xf] %v363_v11  ;;  %68 = vst [vmem:[#allocation0 + $0x98] sm:$0xf] %v364_v12 }
   0xa   :  { %73 = vst [vmem:[#allocation0 + $0x90] sm:$0xf] %v365_v13  ;;  %v366_v14 = vld [vmem:[%s579_s0 + $0x44] sm:$0xf]  ;;  %v367_v15 = vld [vmem:[%s579_s0 + $0x40] sm:$0xf] }
   0xb   :  { %v368_v16 = vld [vmem:[%s579_s0 + $0x3c] sm:$0xf]  ;;  %78 = vst [vmem:[#allocation0 + $0x88] sm:$0xf] %v366_v14  ;;  %83 = vst [vmem:[#allocation0 + $0x80] sm:$0xf] %v367_v15 }
   0xc   :  { %88 = vst [vmem:[#allocation0 + $0x78] sm:$0xf] %v368_v16  ;;  %v369_v17 = vld [vmem:[%s579_s0 + $0x38] sm:$0xf]  ;;  %v370_v18 = vld [vmem:[%s579_s0 + $0x34] sm:$0xf] }
   0xd   :  { %v371_v19 = vld [vmem:[%s579_s0 + $0x30] sm:$0xf]  ;;  %93 = vst [vmem:[#allocation0 + $0x70] sm:$0xf] %v369_v17  ;;  %98 = vst [vmem:[#allocation0 + $0x68] sm:$0xf] %v370_v18 }
   0xe   :  { %103 = vst [vmem:[#allocation0 + $0x60] sm:$0xf] %v371_v19  ;;  %v372_v20 = vld [vmem:[%s579_s0 + $0x2c] sm:$0xf]  ;;  %v373_v21 = vld [vmem:[%s579_s0 + $0x28] sm:$0xf] }
   0xf   :  { %v374_v22 = vld [vmem:[%s579_s0 + $0x24] sm:$0xf]  ;;  %108 = vst [vmem:[#allocation0 + $0x58] sm:$0xf] %v372_v20  ;;  %113 = vst [vmem:[#allocation0 + $0x50] sm:$0xf] %v373_v21 }
  0x10   :  { %118 = vst [vmem:[#allocation0 + $0x48] sm:$0xf] %v374_v22  ;;  %v375_v23 = vld [vmem:[%s579_s0 + $0x20] sm:$0xf]  ;;  %v352_v24 = vld [vmem:[%s579_s0 + $0x7c] sm:$0xf] }
  0x11   :  { %v353_v25 = vld [vmem:[%s579_s0 + $0x78] sm:$0xf]  ;;  %123 = vst [vmem:[#allocation0 + $0x40] sm:$0xf] %v375_v23  ;;  %8 = vst [vmem:[#allocation0 + $0xf8] sm:$0xf] %v352_v24 }
  0x12   :  { %v196_v26 = vld [vmem:[#allocation0 + $0x3] ss:$8 sm:$0xf0]   ;;  %13 = vst [vmem:[#allocation0 + $0xf0] sm:$0xf] %v353_v25  ;;  %vm287_vm4 = vcmask 130112  }
  0x13   :  { %v354_v27 = vld [vmem:[%s579_s0 + $0x74] sm:$0xf]  ;;  %v194_v28 = vld [vmem:[#allocation0 + $0x3] ss:$8 sm:$0xf]  }
  0x14   :  { %18 = vst [vmem:[#allocation0 + $0xe8] sm:$0xf] %v354_v27  ;;  %v355_v29 = vld [vmem:[%s579_s0 + $0x70] sm:$0xf]  ;;  %v198_v30 = vsel %vm162_vm0, %v196_v26, %v194_v28  ;;  %v356_v31 = vld [vmem:[%s579_s0 + $0x6c] sm:$0xf] }
  0x15   :  { %23 = vst [vmem:[#allocation0 + $0xe0] sm:$0xf] %v355_v29  ;;  %v357_v32 = vld [vmem:[%s579_s0 + $0x68] sm:$0xf]  ;;  %v358_v33 = vld [vmem:[%s579_s0 + $0x64] sm:$0xf]  ;;  %199 = vrot.lane.b32.xlu0 %v198_v30, %s398_s10 }
  0x16   :  { %v217_v34 = vld [vmem:[#allocation0 + $0x83] ss:$8 sm:$0xf0]   ;;  %28 = vst [vmem:[#allocation0 + $0xd8] sm:$0xf] %v356_v31 }
  0x17   :  { %33 = vst [vmem:[#allocation0 + $0xd0] sm:$0xf] %v357_v32  ;;  %38 = vst [vmem:[#allocation0 + $0xc8] sm:$0xf] %v358_v33  ;;  %v359_v35 = vld [vmem:[%s579_s0 + $0x60] sm:$0xf] }
  0x18   :  { %v215_v36 = vld [vmem:[#allocation0 + $0x83] ss:$8 sm:$0xf]   ;;  %43 = vst [vmem:[#allocation0 + $0xc0] sm:$0xf] %v359_v35  ;;  %s399_s0 = smov 16  }
  0x19   :  { %v219_v37 = vsel %vm162_vm0, %v217_v34, %v215_v36  ;;  %v206_v38 = vld [vmem:[#allocation0 + $0x43] ss:$8 sm:$0xf0]   ;;  %v237_v39 = vld [vmem:[#allocation0 + $0x2] ss:$8 sm:$0xf]  }
  0x1a   :  { %220 = vrot.lane.b32.xlu1 %v219_v37, %s398_s10  ;;  %v204_v40 = vld [vmem:[#allocation0 + $0x43] ss:$8 sm:$0xf]   ;;  %v239_v41 = vld [vmem:[#allocation0 + $0x2] ss:$8 sm:$0xf0]  }
  0x1b   :  { %v208_v42 = vsel %vm162_vm0, %v206_v38, %v204_v40  ;;  %v249_v44 = vld [vmem:[#allocation0 + $0x42] ss:$8 sm:$0xf0]   ;;  %v241_v45 = vsel %vm162_vm0, %v239_v41, %v237_v39  ;;  %v280_v52 = vld [vmem:[#allocation0 + $0x1] ss:$8 sm:$0xf]  }
  0x1c   :  { %209 = vrot.lane.b32.xlu0 %v208_v42, %s398_s10  ;;  %v228_v43 = vld [vmem:[#allocation0 + $0xc3] ss:$8 sm:$0xf0]   ;;  %v247_v46 = vld [vmem:[#allocation0 + $0x42] ss:$8 sm:$0xf]  }
  0x1d   :  { %v258_v47 = vld [vmem:[#allocation0 + $0x82] ss:$8 sm:$0xf]   ;;  %v251_v53 = vsel %vm162_vm0, %v249_v44, %v247_v46  ;;  %v282_v55 = vld [vmem:[#allocation0 + $0x1] ss:$8 sm:$0xf0]  }
  0x1e   :  { %v260_v49 = vld [vmem:[#allocation0 + $0x82] ss:$8 sm:$0xf0]   ;;  %v160_v56 = vld [vmem:[#allocation0] ss:$8 sm:$0xf]   ;;  %v284_v4 = vsel %vm162_vm0, %v282_v55, %v280_v52 }
  0x1f   :  { %v226_v48 = vld [vmem:[#allocation0 + $0xc3] ss:$8 sm:$0xf]   ;;  %v271_v51 = vld [vmem:[#allocation0 + $0xc2] ss:$8 sm:$0xf0]   ;;  %v262_v54 = vsel %vm162_vm0, %v260_v49, %v258_v47 }
  0x20   :  { %v230_v50 = vsel %vm162_vm0, %v228_v43, %v226_v48  ;;  %242 = vrot.lane.b32.xlu0 %v241_v45, %s399_s0  ;;  %v269_v57 = vld [vmem:[#allocation0 + $0xc2] ss:$8 sm:$0xf]   ;;  %v161_v58 = vld [vmem:[#allocation0] ss:$8 sm:$0xf0]  }
  0x21   :  { %231 = vrot.lane.b32.xlu1 %v230_v50, %s398_s10  ;;  %v163_v59 = vsel %vm162_vm0, %v161_v58, %v160_v56  ;;  %v176_v60 = vld [vmem:[#allocation0 + $0x80] ss:$8 sm:$0xf]   ;;  %v290_v62 = vld [vmem:[#allocation0 + $0x41] ss:$8 sm:$0xf]   ;;  %v273_v3 = vsel %vm162_vm0, %v271_v51, %v269_v57 }
  0x22   :  { %v178_v61 = vld [vmem:[#allocation0 + $0x80] ss:$8 sm:$0xf0]   ;;  %v292_v63 = vld [vmem:[#allocation0 + $0x41] ss:$8 sm:$0xf0]  }
  0x23   :  { %165 = vst.msk [vmem:[%s580_s1] sm:$0xff] %vm164_vm1, %v163_v59   ;;  %v180_v0 = vsel %vm162_vm0, %v178_v61, %v176_v60  ;;  %v167_v1 = vld [vmem:[#allocation0 + $0x40] ss:$8 sm:$0xf]   ;;  %v294_v11 = vsel %vm162_vm0, %v292_v63, %v290_v62 }
  0x24   :  { %263 = vrot.lane.b32.xlu0 %v262_v54, %s399_s0  ;;  %v169_v2 = vld [vmem:[#allocation0 + $0x40] ss:$8 sm:$0xf0]   ;;  %384 = vst.msk [vmem:[%s580_s1 + $0x10] sm:$0xff] %vm164_vm1, %v180_v0  }
  0x25   :  { %252 = vrot.lane.b32.xlu1 %v251_v53, %s399_s0  ;;  %v171_v5 = vsel %vm162_vm0, %v169_v2, %v167_v1  ;;  %v185_v6 = vld [vmem:[#allocation0 + $0xc0] ss:$8 sm:$0xf]   ;;  %v301_v8 = vld [vmem:[#allocation0 + $0x81] ss:$8 sm:$0xf]  }
  0x26   :  { %v187_v7 = vld [vmem:[#allocation0 + $0xc0] ss:$8 sm:$0xf0]   ;;  %v303_v9 = vld [vmem:[#allocation0 + $0x81] ss:$8 sm:$0xf0]  }
  0x27   :  { %383 = vst.msk [vmem:[%s580_s1 + $0x8] sm:$0xff] %vm164_vm1, %v171_v5   ;;  %v189_v10 = vsel %vm162_vm0, %v187_v7, %v185_v6  ;;  %v305_v12 = vsel %vm162_vm0, %v303_v9, %v301_v8  ;;  %v312_v13 = vld [vmem:[#allocation0 + $0xc1] ss:$8 sm:$0xf]  }
  0x28   :  { %385 = vst.msk [vmem:[%s580_s1 + $0x18] sm:$0xff] %vm164_vm1, %v189_v10   ;;  %285 = vrot.lane.b32.xlu0 %v284_v4, %s400_s21  ;;  %v314_v14 = vld [vmem:[#allocation0 + $0xc1] ss:$8 sm:$0xf0]  }
  0x29   :  { %274 = vrot.lane.b32.xlu1 %v273_v3, %s399_s0  ;;  %v316_v15 = vsel %vm162_vm0, %v314_v14, %v312_v13 }
  0x2c   :  { %306 = vrot.lane.b32.xlu0 %v305_v12, %s400_s21 }
  0x2d   :  { %295 = vrot.lane.b32.xlu1 %v294_v11, %s400_s21 }
  0x31   :  { %317 = vrot.lane.b32.xlu1 %v316_v15, %s400_s21 }
  0x87   :  { %v200_v16 = vpop.permute.xlu0 %199  }
  0x88   :  { %202 = vst.msk [vmem:[%s580_s1] sm:$0xff] %vm201_vm2, %v200_v16  }
  0x8c   :  { %v221_v17 = vpop.permute.xlu1 %220  }
  0x8d   :  { %387 = vst.msk [vmem:[%s580_s1 + $0x10] sm:$0xff] %vm201_vm2, %v221_v17  }
  0x8e   :  { %v210_v18 = vpop.permute.xlu0 %209  }
  0x8f   :  { %386 = vst.msk [vmem:[%s580_s1 + $0x8] sm:$0xff] %vm201_vm2, %v210_v18  }
  0x92   :  { %v243_v20 = vpop.permute.xlu0 %242  }
  0x93   :  { %v232_v19 = vpop.permute.xlu1 %231   ;;  %245 = vst.msk [vmem:[%s580_s1] sm:$0xff] %vm244_vm3, %v243_v20  }
  0x94   :  { %388 = vst.msk [vmem:[%s580_s1 + $0x18] sm:$0xff] %vm201_vm2, %v232_v19  }
  0x96   :  { %v264_v22 = vpop.permute.xlu0 %263  }
  0x97   :  { %v253_v21 = vpop.permute.xlu1 %252   ;;  %390 = vst.msk [vmem:[%s580_s1 + $0x10] sm:$0xff] %vm244_vm3, %v264_v22  }
  0x98   :  { %389 = vst.msk [vmem:[%s580_s1 + $0x8] sm:$0xff] %vm244_vm3, %v253_v21  }
  0x9a   :  { %v286_v24 = vpop.permute.xlu0 %285  }
  0x9b   :  { %v275_v23 = vpop.permute.xlu1 %274   ;;  %288 = vst.msk [vmem:[%s580_s1] sm:$0xff] %vm287_vm4, %v286_v24  }
  0x9c   :  { %391 = vst.msk [vmem:[%s580_s1 + $0x18] sm:$0xff] %vm244_vm3, %v275_v23  }
  0x9e   :  { %v307_v26 = vpop.permute.xlu0 %306  }
  0x9f   :  { %v296_v25 = vpop.permute.xlu1 %295   ;;  %393 = vst.msk [vmem:[%s580_s1 + $0x10] sm:$0xff] %vm287_vm4, %v307_v26  }
  0xa0   :  { %392 = vst.msk [vmem:[%s580_s1 + $0x8] sm:$0xff] %vm287_vm4, %v296_v25  }
  0xa3   :  { %v318_v27 = vpop.permute.xlu1 %317  }
  0xa4   :  { %394 = vst.msk [vmem:[%s580_s1 + $0x18] sm:$0xff] %vm287_vm4, %v318_v27  }

// kernel: transformer_forward.1
= control target key start
LH: loop header
LB: loop body
LE: loop exit
PB: predicated region body
PF: predicated region fallthrough
CT: control target
= control target key end

     0   :  { %11 = vsyncpa [#allocation3], 0  ;;  %s2484_s21 = smov [#allocation2]   ;;  %s2945_s0 = inlined_call_operand.vmem [shape: s32[8,2], index: 0, kind: input, shape index: {}]   ;;  %s2946_s1 = inlined_call_operand.vmem [shape: f32[64,32], index: 1, kind: input, shape index: {}]   ;;  %s2947_s2 = inlined_call_operand.vmem [shape: f32[16,32], index: 2, kind: input, shape index: {}]   ;;  %s2948_s3 = inlined_call_operand.vmem [shape: f32[32,32], index: 3, kind: input, shape index: {}]   ;;  %s2949_s4 = inlined_call_operand.hbm [shape: f32[80,384], index: 4, kind: input, shape index: {}]   ;;  %s2950_s5 = inlined_call_operand.vmem [shape: f32[312,128], index: 5, kind: input, shape index: {}]   ;;  %s2951_s6 = inlined_call_operand.vmem [shape: f32[8,128], index: 6, kind: output, shape index: {}]  }
   0x1   :  { %s25_s22 = sshll.u32 %s2484_s21, 4  ;;  %s2460_s25 = scalar_lea.hbm %s2949_s4, 3840  ;;  %s26_s22 = int_to_ptr.vmem [resolvable:$true] %s25_s22 }
   0x2   :  { %p2461_p0 = scmp.ne.s32.totalorder %s2949_s4, %s2460_s25  ;;  %p2464_p1 = scmp.lt.u32.totalorder %s2460_s25, %s2949_s4 }
   0x4   :  { %p2466_p2 = pnand %p2464_p1, %p2461_p0 }
   0x6   :  { %2469 = shalt.err (!%p2466_p2)
}
   0x7   :  { %s2470_s30 = scalar_lea.vmem %s26_s22, 3840  ;;  %p2475_p4 = scmp.lt.s32.totalorder %s26_s22, %s26_s22 }
   0x8   :  { %p2471_p3 = scmp.ne.s32.totalorder %s26_s22, %s2470_s30  ;;  %p2476_p5 = scmp.lt.s32.totalorder %s2470_s30, %s2470_s30 }
   0xa   :  { %p2477_p6 = por %p2476_p5, %p2475_p4 }
   0xc   :  { %p2478_p7 = pnand %p2477_p6, %p2471_p3 }
   0xe   :  { %2481 = shalt.err (!%p2478_p7)
}
   0xf   :  { %s2485_s7 = smov 384   ;;  %s2486_s8 = smov 24  }
  0x10   :  { %31 = dma.hbm_to_vmem [thread:$0]  %s2949_s4, 3840, %s26_s22, [#allocation3], %s2485_s7, %s2485_s7, %s2486_s8  }
  0x11   :  { %2482 = dma.done.wait [#allocation3], 3840  }
  0x12   :  { %2483 = vsyncadd [#allocation3], 4294963456  ;;  %v2487_v0 = vmov 0   ;;  %v37_v1 = vld [vmem:[%s2945_s0] sm:$0xff]  ;;  %v53_v3 = vld [vmem:[%s2946_s1 + $0x8] sm:$0xff]  ;;  %v2488_v10 = vmov 0.0   ;;  %v38_v22 = vlaneseq }
  0x13   :  { %2410 = vset.pattern.permute.xlu0 %v2487_v0  ;;  %v52_v2 = vld [vmem:[%s2946_s1] sm:$0xff]  ;;  %v54_v5 = vld [vmem:[%s2946_s1 + $0x10] sm:$0xff]  ;;  %v55_v6 = vld [vmem:[%s2946_s1 + $0x18] sm:$0xff]  ;;  %266 = vmatprep.mubr.f32.mxu1 %v2488_v10  ;;  %v2489_v11 = vmov 1   ;;  %vm62_vm0 = vcmask 523264   ;;  %vm195_vm3 = vcmask 261120  }
  0x14   :  { %41 = vperm.xlu0 %2410, %v37_v1   ;;  %v2241_v4 = vpack.c.bf16 %v53_v3, %v52_v2  ;;  %v2245_v7 = vpack.c.bf16 %v55_v6, %v54_v5  ;;  %v56_v8 = vld [vmem:[%s2946_s1 + $0x20] sm:$0xff]  ;;  %v57_v9 = vld [vmem:[%s2946_s1 + $0x28] sm:$0xff]  ;;  %v58_v13 = vld [vmem:[%s2946_s1 + $0x30] sm:$0xff]  ;;  %v39_v23 = vand.u32 127, %v38_v22  ;;  %v2591_v46 = vshrl.u32 %v38_v22, 7  ;;  %s2491_s0 = smov 16  }
  0x15   :  { %v2249_v12 = vpack.c.bf16 %v57_v9, %v56_v8  ;;  %v59_v14 = vld [vmem:[%s2946_s1 + $0x38] sm:$0xff]  ;;  %v149_v15 = vld [vmem:[#allocation2 + $0x8] sm:$0xff]  ;;  %v152_v16 = vld [vmem:[#allocation2 + $0x20] sm:$0xff]  ;;  %vm374_vm4 = vcmask 130048   ;;  %s2492_s7 = smov 64  }
  0x16   :  { %2242 = vmatprep.subr.bf16.mxu0 %v2241_v4  ;;  %v148_v17 = vld [vmem:[#allocation2] sm:$0xff]  ;;  %v2253_v18 = vpack.c.bf16 %v59_v14, %v58_v13  ;;  %v2257_v19 = vpack.c.bf16 %v152_v16, %v149_v15  ;;  %v151_v20 = vld [vmem:[#allocation2 + $0x18] sm:$0xff]  ;;  %v158_v29 = vld [vmem:[#allocation2 + $0x50] sm:$0xff]  ;;  %v2594_v47 = vsub.s32 0, %v2591_v46  ;;  %v2599_v49 = vsub.s32 1, %v2591_v46 }
  0x17   :  { %2244 = vmatpush3.bf16.msra.mxu0 %v2241_v4  ;;  %v2259_v21 = vpack.c.bf16 %v151_v20, %v148_v17  ;;  %v155_v28 = vld [vmem:[#allocation2 + $0x38] sm:$0xff]  ;;  %v154_v31 = vld [vmem:[#allocation2 + $0x30] sm:$0xff]  ;;  %v157_v32 = vld [vmem:[#allocation2 + $0x48] sm:$0xff] }
  0x18   :  { %2411 = vset.pattern.permute.xlu0 %v2489_v11  ;;  %2246 = vmatprep.subr.bf16.mxu0 %v2245_v7  ;;  %v2261_v30 = vpack.c.bf16 %v158_v29, %v155_v28  ;;  %v2263_v33 = vpack.c.bf16 %v157_v32, %v154_v31  ;;  %v150_v34 = vld [vmem:[#allocation2 + $0x10] sm:$0xff]  ;;  %v153_v35 = vld [vmem:[#allocation2 + $0x28] sm:$0xff]  ;;  %v60_v37 = vld [vmem:[%s2947_s2] sm:$0xff] }
  0x19   :  { %47 = vperm.xlu0 %2411, %v37_v1   ;;  %2258 = vmatprep.subr.bf16.mxu1 %v2257_v19  ;;  %v2265_v36 = vpack.c.bf16 %v153_v35, %v150_v34  ;;  %v156_v38 = vld [vmem:[#allocation2 + $0x40] sm:$0xff]  ;;  %v159_v39 = vld [vmem:[#allocation2 + $0x58] sm:$0xff]  ;;  %v61_v44 = vld [vmem:[%s2947_s2 + $0x8] sm:$0xff]  ;;  %s2490_s2 = smov 112  }
  0x1a   :  { %2260 = vmatpush1.bf16.msra.mxu1 %v2259_v21  ;;  %v2269_v43 = vpack.c.bf16 %v159_v39, %v156_v38  ;;  %v2596_v48 = vld [vmem:[#allocation2 + $0x60] ss:$8 sm:$0x7]  ;;  %vm2616_vm5 = vmpackc.low %vm374_vm4, %vm374_vm4  ;;  %v2646_v15 = vld [vmem:[%s2948_s3 + $0x18] sm:$0xff] }
  0x1b   :  { %2248 = vmatpush3.bf16.msra.mxu0 %v2245_v7  ;;  %2262 = vmatprep.subr.bf16.mxu1 %v2261_v30  ;;  %v183_v50 = vrot.slane %v2596_v48, %v2594_v47  ;;  %v187_v51 = vrot.slane %v2596_v48, %v2599_v49  ;;  %v2634_v6 = vld [vmem:[%s2948_s3 + $0x8] sm:$0xff]  ;;  %v2639_v9 = vld [vmem:[%s2948_s3] sm:$0xff]  ;;  %v2652_v19 = vld [vmem:[%s2948_s3 + $0x10] sm:$0xff] }
  0x1c   :  { %2250 = vmatprep.subr.bf16.mxu0 %v2249_v12 }
  0x1e   :  { %2264 = vmatpush1.bf16.msra.mxu1 %v2263_v33 }
  0x1f   :  { %2252 = vmatpush3.bf16.msra.mxu0 %v2249_v12  ;;  %2266 = vmatprep.subr.bf16.mxu1 %v2265_v36 }
  0x20   :  { %2254 = vmatprep.subr.bf16.mxu0 %v2253_v18 }
  0x23   :  { %2256 = vmatpush3.bf16.msra.mxu0 %v2253_v18 }
  0x93   :  { %v42_v24 = vpop.permute.xlu0 %41 }
  0x94   :  { %vm43_vm1 = vcmp.eq.s32.totalorder %v39_v23, %v42_v24 }
  0x95   :  { %v1896_v25 = vsel %vm43_vm1, 1.0, %v2488_v10 }
  0x96   :  { %2067 = vmatprep.mubr.msk.f32.mxu0 %vm62_vm0, %v1896_v25 }
  0x98   :  { %v48_v26 = vpop.permute.xlu0 %47 }
  0x99   :  { %vm49_vm2 = vcmp.eq.s32.totalorder %v39_v23, %v48_v26 }
  0x9a   :  { %v1897_v27 = vsel %vm49_vm2, 1.0, %v2488_v10 }
  0x9b   :  { %2068 = vmatmul.mubr.msk.f32.vlgmr.msra.gmra.mrb[0].mxu0 %vm62_vm0, %v1897_v27 }
 0x16e   :  { %v2069_v40 = vpop.f32.mrb[0].mxu0 }
 0x16f   :  { %v135_v41 = vpop.f32.mrb[1].mxu0  ;;  %v2583_v45 = vadd.f32 %v2069_v40, %v61_v44 }
 0x170   :  { %v2575_v42 = vadd.f32 %v135_v41, %v60_v37 }
 0x172   :  { %1900 = vmatmul.mubr.msk.f32.vlgmr.msra.gmra.mrb[0].mxu1 %vm195_vm3, %v2575_v42 }
 0x173   :  { %2268 = vmatpush3.bf16.msra.mxu1 %v2265_v36  ;;  %272 = vmatprep.mubr.f32.mxu1 %v2488_v10 }
 0x174   :  { %2270 = vmatprep.subr.bf16.mxu1 %v2269_v43 }
 0x176   :  { %1901 = vmatmul.mubr.msk.f32.gmra.mrb[2].mxu1 %vm195_vm3, %v2583_v45 }
 0x177   :  { %2272 = vmatpush3.bf16.msra.mxu1 %v2269_v43  ;;  %2078 = vmatprep.mubr.msk.f32.mxu1 %vm195_vm3, %v2575_v42 }
 0x17a   :  { %2079 = vmatmul.mubr.msk.f32.vlgmr.msra.gmra.mrb[4].mxu1 %vm195_vm3, %v2583_v45 }
 0x245   :  { %v268_v52 = vpop.f32.mrb[0].mxu1 }
 0x246   :  { %v269_v53 = vadd.f32 %v268_v52, %v183_v50  ;;  %v270_v54 = vpop.f32.mrb[1].mxu1  ;;  %v2664_v52 = vsub.s32 2, %v2591_v46 }
 0x247   :  { %v271_v55 = vadd.f32 %v270_v54, %v187_v51 }
 0x248   :  { %2089 = vmatprep.mubr.msk.f32.mxu0 %vm374_vm4, %v269_v53 }
 0x249   :  { %v274_v56 = vpop.f32.mrb[2].mxu1  ;;  %361 = vrot.lane.b32.xlu1 %v271_v55, %s2490_s2 }
 0x24a   :  { %v275_v57 = vadd.f32 %v274_v56, %v183_v50  ;;  %v276_v58 = vpop.f32.mrb[3].mxu1 }
 0x24b   :  { %v277_v59 = vadd.f32 %v276_v58, %v187_v51 }
 0x24c   :  { %358 = vrot.lane.b32.xlu0 %v275_v57, %s2490_s2 }
 0x24d   :  { %v2608_v60 = vpop.f32.mrb[4].mxu1  ;;  %364 = vrot.lane.b32.xlu1 %v277_v59, %s2490_s2 }
 0x24e   :  { %v2611_v61 = vpop.f32.mrb[5].mxu1 }
 0x251   :  { %355 = vrot.lane.b32.xlu1 %v269_v53, %s2490_s2  ;;  %v191_v53 = vrot.slane %v2596_v48, %v2664_v52 }
 0x253   :  { %v351_v54 = vadd.f32 %v2608_v60, %v191_v53 }
 0x2bb   :  { %v362_v62 = vpop.permute.xlu1 %361 }
 0x2bc   :  { %v2273_v0 = vpack.c.bf16 %v362_v62, %v271_v55  ;;  %v346_v55 = vadd.f32 %v2611_v61, %v191_v53  ;;  %v167_v53 = vld [vmem:[%s2950_s5 + $0x28] sm:$0xff] }
 0x2be   :  { %2275 = vmatprep.subr.msk.bf16.mxu0 %vm2616_vm5, %v2273_v0  ;;  %v359_v4 = vpop.permute.xlu0 %358 }
 0x2bf   :  { %2278 = vmatpush3.bf16.xpose.msk.msra.mxu0 %vm2616_vm5, %v2273_v0  ;;  %v365_v1 = vpop.permute.xlu1 %364 }
 0x2c0   :  { %v2279_v2 = vpack.c.bf16 %v365_v1, %v277_v59 }
 0x2c2   :  { %2281 = vmatprep.subr.msk.bf16.mxu0 %vm2616_vm5, %v2279_v2 }
 0x2c3   :  { %v356_v3 = vpop.permute.xlu1 %355 }
 0x2c7   :  { %2284 = vmatpush3.bf16.xpose.msk.msra.mxu0 %vm2616_vm5, %v2279_v2 }
 0x2ce   :  { %2090 = vmatmul.mubr.msk.f32.vlgmr.msra.gmra.mrb[2].mxu0 %vm374_vm4, %v356_v3 }
 0x2cf   :  { %2092 = vmatprep.mubr.msk.f32.mxu0 %vm374_vm4, %v275_v57 }
 0x2d2   :  { %2093 = vmatmul.mubr.msk.f32.gmra.mrb[4].mxu0 %vm374_vm4, %v359_v4 }
 0x3a1   :  { %v2091_v5 = vpop.f32.mrb[2].mxu0 }
 0x3a2   :  { %v477_v7 = vmul.f32 0.25, %v2091_v5  ;;  %v457_v8 = vpop.f32.mrb[3].mxu0 }
 0x3a3   :  { %v476_v11 = vmul.f32 0.25, %v457_v8 }
 0x3a4   :  { %v481_v12 = vadd.f32 %v477_v7, %v2634_v6 }
 0x3a5   :  { %v2094_v13 = vpop.f32.mrb[4].mxu0  ;;  %v480_v14 = vadd.f32 %v476_v11, %v2639_v9  ;;  %v162_v11 = vld [vmem:[%s2950_s5] sm:$0xff] }
 0x3a6   :  { %v479_v16 = vmul.f32 0.25, %v2094_v13  ;;  %v467_v17 = vpop.f32.mrb[5].mxu0  ;;  %v487_v18 = vsel %vm195_vm3, %v481_v12, -inf }
 0x3a7   :  { %v478_v20 = vmul.f32 0.25, %v467_v17  ;;  %488 = vmax.xlane.f32.xlu0 %v487_v18  ;;  %v484_v21 = vsel %vm195_vm3, %v480_v14, -inf }
 0x3a8   :  { %485 = vmax.xlane.f32.xlu1 %v484_v21  ;;  %v483_v22 = vadd.f32 %v479_v16, %v2646_v15  ;;  %v165_v16 = vld [vmem:[%s2950_s5 + $0x18] sm:$0xff] }
 0x3a9   :  { %v482_v23 = vadd.f32 %v478_v20, %v2652_v19 }
 0x3aa   :  { %v493_v24 = vsel %vm195_vm3, %v483_v22, -inf }
 0x3ab   :  { %v490_v25 = vsel %vm195_vm3, %v482_v23, -inf }
 0x3ac   :  { %494 = vmax.xlane.f32.xlu1 %v493_v24  ;;  %491 = vmax.xlane.f32.xlu0 %v490_v25 }
 0x434   :  { %v489_v26 = vpop.xlane.xlu0 %488 }
 0x435   :  { %v497_v27 = vsub.f32 %v481_v12, %v489_v26  ;;  %v486_v28 = vpop.xlane.xlu1 %485  ;;  %v163_v12 = vld [vmem:[%s2950_s5 + $0x8] sm:$0xff] }
 0x436   :  { %v496_v29 = vsub.f32 %v480_v14, %v486_v28  ;;  %v2293_v13 = vpack.c.bf16 %v163_v12, %v162_v11  ;;  %v164_v14 = vld [vmem:[%s2950_s5 + $0x10] sm:$0xff] }
 0x437   :  { %v502_v30 = vmul.f32 1.442695, %v497_v27  ;;  %v2297_v17 = vpack.c.bf16 %v165_v16, %v164_v14  ;;  %v2697_v27 = vld [vmem:[%s2950_s5 + $0x80] sm:$0xff] }
 0x438   :  { %v500_v31 = vmul.f32 1.442695, %v496_v29  ;;  %v638_v28 = vrot.slane %v2697_v27, %v2594_v47  ;;  %v752_v12 = vrot.slane %v2697_v27, %v2599_v49 }
 0x439   :  { %2412 = vpow2.f32 %v502_v30  ;;  %v495_v32 = vpop.xlane.xlu1 %494  ;;  %v492_v33 = vpop.xlane.xlu0 %491 }
 0x43a   :  { %2414 = vpow2.f32 %v500_v31  ;;  %v499_v34 = vsub.f32 %v483_v22, %v495_v32  ;;  %v498_v35 = vsub.f32 %v482_v23, %v492_v33 }
 0x43c   :  { %v506_v36 = vmul.f32 1.442695, %v499_v34  ;;  %v504_v37 = vmul.f32 1.442695, %v498_v35 }
 0x43e   :  { %2416 = vpow2.f32 %v506_v36 }
 0x43f   :  { %2418 = vpow2.f32 %v504_v37 }
 0x443   :  { %v2413_v38 = vpop.eup %2412 }
 0x444   :  { %v2415_v39 = vpop.eup %2414  ;;  %v511_v40 = vsel %vm195_vm3, %v2413_v38, 0.0 }
 0x445   :  { %512 = vadd.xlane.f32.xlu1 %v511_v40  ;;  %v508_v41 = vsel %vm195_vm3, %v2415_v39, 0.0 }
 0x446   :  { %509 = vadd.xlane.f32.xlu0 %v508_v41 }
 0x448   :  { %v2417_v43 = vpop.eup %2416 }
 0x449   :  { %v2419_v44 = vpop.eup %2418  ;;  %v517_v50 = vsel %vm195_vm3, %v2417_v43, 0.0 }
 0x44a   :  { %518 = vadd.xlane.f32.xlu1 %v517_v50  ;;  %v514_v51 = vsel %vm195_vm3, %v2419_v44, 0.0 }
 0x44b   :  { %515 = vadd.xlane.f32.xlu0 %v514_v51 }
 0x45b   :  { %371 = vrot.lane.b32.xlu1 %v351_v54, %s2490_s2 }
 0x461   :  { %367 = vrot.lane.b32.xlu0 %v346_v55, %s2490_s2 }
 0x4d2   :  { %v513_v56 = vpop.xlane.xlu1 %512 }
 0x4d3   :  { %v510_v57 = vpop.xlane.xlu0 %509 }
 0x4d4   :  { %2420 = vrcp.f32 %v510_v57 }
 0x4d5   :  { %2422 = vrcp.f32 %v513_v56  ;;  %v169_v56 = vld [vmem:[%s2950_s5 + $0x38] sm:$0xff] }
 0x4d7   :  { %v519_v58 = vpop.xlane.xlu1 %518 }
 0x4d8   :  { %v516_v59 = vpop.xlane.xlu0 %515 }
 0x4d9   :  { %2424 = vrcp.f32 %v516_v59  ;;  %v171_v59 = vld [vmem:[%s2950_s5 + $0x48] sm:$0xff] }
 0x4da   :  { %2426 = vrcp.f32 %v519_v58  ;;  %v170_v58 = vld [vmem:[%s2950_s5 + $0x40] sm:$0xff] }
 0x4db   :  { %v372_v62 = vpop.permute.xlu1 %371 }
 0x4dc   :  { %v368_v0 = vpop.permute.xlu0 %367  ;;  %v2289_v2 = vpack.c.bf16 %v372_v62, %v351_v54  ;;  %v172_v62 = vld [vmem:[%s2950_s5 + $0x50] sm:$0xff] }
 0x4dd   :  { %v2285_v1 = vpack.c.bf16 %v368_v0, %v346_v55  ;;  %v168_v55 = vld [vmem:[%s2950_s5 + $0x30] sm:$0xff]  ;;  %v2309_v0 = vpack.c.bf16 %v171_v59, %v170_v58 }
 0x4de   :  { %v2421_v48 = vpop.eup %2420  ;;  %v2305_v57 = vpack.c.bf16 %v169_v56, %v168_v55 }
 0x4df   :  { %2286 = vmatprep.subr.bf16.mxu1 %v2285_v1  ;;  %v521_v60 = vmul.f32 %v2421_v48, %v2415_v39  ;;  %v2423_v61 = vpop.eup %2422 }
 0x4e0   :  { %2288 = vmatpush3.bf16.msra.mxu1 %v2285_v1  ;;  %v523_v4 = vmul.f32 %v2423_v61, %v2413_v38  ;;  %v173_v1 = vld [vmem:[%s2950_s5 + $0x58] sm:$0xff] }
 0x4e1   :  { %2290 = vmatprep.subr.bf16.mxu1 %v2289_v2  ;;  %2103 = vmatprep.mubr.msk.f32.mxu1 %vm195_vm3, %v521_v60  ;;  %v2313_v48 = vpack.c.bf16 %v173_v1, %v172_v62  ;;  %v175_v60 = vld [vmem:[%s2950_s5 + $0x68] sm:$0xff]  ;;  %v977_v1 = vld [vmem:[#allocation2 + $0x98] sm:$0xff] }
 0x4e3   :  { %v2425_v3 = vpop.eup %2424 }
 0x4e4   :  { %2292 = vmatpush3.bf16.msra.mxu1 %v2289_v2  ;;  %v2427_v5 = vpop.eup %2426  ;;  %v525_v7 = vmul.f32 %v2425_v3, %v2419_v44  ;;  %v174_v2 = vld [vmem:[%s2950_s5 + $0x60] sm:$0xff] }
 0x4e5   :  { %v527_v8 = vmul.f32 %v2427_v5, %v2417_v43  ;;  %2294 = vmatprep.subr.bf16.mxu1 %v2293_v13  ;;  %v2317_v61 = vpack.c.bf16 %v175_v60, %v174_v2  ;;  %v973_v2 = vld [vmem:[#allocation2 + $0x78] sm:$0xff]  ;;  %v976_v60 = vld [vmem:[#allocation2 + $0x90] sm:$0xff] }
 0x4e7   :  { %2104 = vmatmul.mubr.msk.f32.vlgmr.msra.gmra.mrb[6].mxu1 %vm195_vm3, %v523_v4 }
 0x4e8   :  { %2106 = vmatprep.mubr.msk.f32.mxu1 %vm195_vm3, %v525_v7  ;;  %2296 = vmatpush3.bf16.msra.mxu1 %v2293_v13 }
 0x4e9   :  { %2298 = vmatprep.subr.bf16.mxu1 %v2297_v17 }
 0x4eb   :  { %2107 = vmatmul.mubr.msk.f32.gmra.mrb[8].mxu1 %vm195_vm3, %v527_v8 }
 0x4ec   :  { %2300 = vmatpush3.bf16.msra.mxu1 %v2297_v17 }
 0x4ed   :  { %2310 = vmatprep.subr.bf16.mxu1 %v2309_v0 }
 0x5ba   :  { %v2105_v18 = vpop.f32.mrb[6].mxu1 }
 0x5bb   :  { %626 = vrot.lane.b32.xlu1 %v2105_v18, %s2491_s0  ;;  %v606_v20 = vpop.f32.mrb[7].mxu1  ;;  %v758_v18 = vrot.slane %v2697_v27, %v2664_v52 }
 0x5be   :  { %v2108_v21 = vpop.f32.mrb[8].mxu1 }
 0x5bf   :  { %631 = vrot.lane.b32.xlu0 %v2108_v21, %s2491_s0  ;;  %v616_v22 = vpop.f32.mrb[9].mxu1 }
 0x62d   :  { %v627_v23 = vpop.permute.xlu1 %626 }
 0x62e   :  { %v629_v24 = vsel %vm374_vm4, %v606_v20, %v627_v23 }
 0x62f   :  { %2117 = vmatprep.mubr.msk.f32.mxu1 %vm195_vm3, %v629_v24  ;;  %v176_v24 = vld [vmem:[%s2950_s5 + $0x70] sm:$0xff] }
 0x631   :  { %v632_v25 = vpop.permute.xlu0 %631 }
 0x632   :  { %v634_v26 = vsel %vm374_vm4, %v616_v22, %v632_v25  ;;  %v177_v25 = vld [vmem:[%s2950_s5 + $0x78] sm:$0xff] }
 0x633   :  { %2118 = vmatmul.mubr.msk.f32.vlgmr.msra.gmra.mrb[10].mxu1 %vm195_vm3, %v634_v26  ;;  %v2321_v26 = vpack.c.bf16 %v177_v25, %v176_v24  ;;  %v969_v24 = vsub.s32 4, %v2591_v46 }
 0x634   :  { %2312 = vmatpush3.bf16.msra.mxu1 %v2309_v0  ;;  %v974_v0 = vld [vmem:[#allocation2 + $0x80] sm:$0xff] }
 0x635   :  { %2314 = vmatprep.subr.bf16.mxu1 %v2313_v48 }
 0x638   :  { %2316 = vmatpush3.bf16.msra.mxu1 %v2313_v48  ;;  %v2325_v48 = vpack.c.bf16 %v977_v1, %v974_v0 }
 0x639   :  { %2318 = vmatprep.subr.bf16.mxu1 %v2317_v61 }
 0x63c   :  { %2320 = vmatpush3.bf16.msra.mxu1 %v2317_v61  ;;  %v2327_v61 = vpack.c.bf16 %v976_v60, %v973_v2 }
 0x63d   :  { %2322 = vmatprep.subr.bf16.mxu1 %v2321_v26 }
 0x640   :  { %2324 = vmatpush3.bf16.msra.mxu1 %v2321_v26 }
 0x706   :  { %v2119_v29 = vpop.f32.mrb[10].mxu1 }
 0x707   :  { %v717_v30 = vadd.f32 %v2119_v29, %v638_v28  ;;  %v711_v31 = vpop.f32.mrb[11].mxu1 }
 0x708   :  { %v712_v32 = vadd.f32 %v711_v31, %v638_v28  ;;  %v763_v28 = vsub.s32 5, %v2591_v46 }
 0x709   :  { %v721_v33 = vadd.f32 %v717_v30, %v2583_v45 }
 0x70a   :  { %v720_v34 = vadd.f32 %v712_v32, %v2575_v42  ;;  %v166_v42 = vld [vmem:[%s2950_s5 + $0x20] sm:$0xff]  ;;  %v764_v29 = vrot.slane %v2697_v27, %v763_v28 }
 0x70b   :  { %v725_v35 = vsel %vm195_vm3, %v721_v33, 0.0  ;;  %v2301_v54 = vpack.c.bf16 %v167_v53, %v166_v42 }
 0x70c   :  { %726 = vadd.xlane.f32.xlu0 %v725_v35  ;;  %v722_v36 = vsel %vm195_vm3, %v720_v34, 0.0 }
 0x70d   :  { %723 = vadd.xlane.f32.xlu1 %v722_v36  ;;  %2302 = vmatprep.subr.bf16.mxu0 %v2301_v54  ;;  %v850_v36 = vsub.s32 6, %v2591_v46 }
 0x70e   :  { %2304 = vmatpush3.bf16.msra.mxu0 %v2301_v54 }
 0x70f   :  { %2306 = vmatprep.subr.bf16.mxu0 %v2305_v57 }
 0x712   :  { %2308 = vmatpush3.bf16.msra.mxu0 %v2305_v57 }
 0x713   :  { %2326 = vmatprep.subr.bf16.mxu0 %v2325_v48 }
 0x799   :  { %v727_v37 = vpop.xlane.xlu0 %726 }
 0x79a   :  { %v730_v38 = vmul.f32 0.03125, %v727_v37  ;;  %v724_v39 = vpop.xlane.xlu1 %723  ;;  %v851_v37 = vrot.slane %v2697_v27, %v850_v36 }
 0x79b   :  { %v729_v40 = vmul.f32 0.03125, %v724_v39 }
 0x79c   :  { %v732_v41 = vsub.f32 %v721_v33, %v730_v38 }
 0x79d   :  { %v731_v43 = vsub.f32 %v720_v34, %v729_v40 }
 0x79e   :  { %v734_v44 = vmul.f32 %v732_v41, %v732_v41 }
 0x79f   :  { %v733_v50 = vmul.f32 %v731_v43, %v731_v43 }
 0x7a0   :  { %v738_v51 = vsel %vm195_vm3, %v734_v44, 0.0 }
 0x7a1   :  { %739 = vadd.xlane.f32.xlu1 %v738_v51  ;;  %v735_v45 = vsel %vm195_vm3, %v733_v50, 0.0 }
 0x7a2   :  { %736 = vadd.xlane.f32.xlu0 %v735_v45 }
 0x82e   :  { %v740_v3 = vpop.xlane.xlu1 %739 }
 0x82f   :  { %v742_v4 = vmul.f32 0.03125, %v740_v3  ;;  %v737_v5 = vpop.xlane.xlu0 %736  ;;  %v980_v3 = vld [vmem:[#allocation2 + $0xb0] sm:$0xff] }
 0x830   :  { %v741_v7 = vmul.f32 0.03125, %v737_v5 }
 0x831   :  { %v744_v8 = vadd.f32 1e-05, %v742_v4  ;;  %v983_v4 = vld [vmem:[#allocation2 + $0xc8] sm:$0xff] }
 0x832   :  { %v743_v11 = vadd.f32 1e-05, %v741_v7  ;;  %v2329_v5 = vpack.c.bf16 %v983_v4, %v980_v3  ;;  %v979_v7 = vld [vmem:[#allocation2 + $0xa8] sm:$0xff] }
 0x833   :  { %2428 = vrsqrt.f32 %v744_v8  ;;  %v982_v8 = vld [vmem:[#allocation2 + $0xc0] sm:$0xff] }
 0x834   :  { %2430 = vrsqrt.f32 %v743_v11  ;;  %v2331_v11 = vpack.c.bf16 %v982_v8, %v979_v7 }
 0x83d   :  { %v2429_v13 = vpop.eup %2428 }
 0x83e   :  { %v2431_v14 = vpop.eup %2430  ;;  %v748_v16 = vmul.f32 %v2429_v13, %v732_v41  ;;  %v978_v13 = vld [vmem:[#allocation2 + $0xa0] sm:$0xff] }
 0x83f   :  { %v747_v17 = vmul.f32 %v2431_v14, %v731_v43 }
 0x840   :  { %v754_v20 = vmul.f32 %v752_v12, %v748_v16 }
 0x841   :  { %v753_v21 = vmul.f32 %v752_v12, %v747_v17  ;;  %v975_v12 = vld [vmem:[#allocation2 + $0x88] sm:$0xff] }
 0x842   :  { %v760_v23 = vadd.f32 %v758_v18, %v754_v20  ;;  %v2333_v14 = vpack.c.bf16 %v978_v13, %v975_v12 }
 0x843   :  { %v759_v22 = vadd.f32 %v758_v18, %v753_v21 }
 0x845   :  { %2128 = vmatprep.mubr.msk.f32.mxu0 %vm195_vm3, %v759_v22 }
 0x846   :  { %2129 = vmatmul.mubr.msk.f32.vlgmr.msra.gmra.mrb[6].mxu0 %vm195_vm3, %v760_v23 }
 0x847   :  { %1090 = vmatprep.mubr.f32.mxu0 %v2488_v10  ;;  %2328 = vmatpush1.bf16.msra.mxu0 %v2327_v61 }
 0x848   :  { %2330 = vmatprep.subr.bf16.mxu0 %v2329_v5 }
 0x84b   :  { %2332 = vmatpush1.bf16.msra.mxu0 %v2331_v11 }
 0x84c   :  { %2334 = vmatprep.subr.bf16.mxu0 %v2333_v14 }
 0x919   :  { %v2130_v30 = vpop.f32.mrb[6].mxu0 }
 0x91a   :  { %v843_v31 = vadd.f32 %v2130_v30, %v764_v29  ;;  %v837_v32 = vpop.f32.mrb[7].mxu0 }
 0x91b   :  { %v838_v33 = vadd.f32 %v837_v32, %v764_v29 }
 0x91c   :  { %v847_v35 = vmax.f32 %v843_v31, 0.0  ;;  %v970_v31 = vrot.slane %v2697_v27, %v969_v24 }
 0x91d   :  { %v846_v34 = vmax.f32 %v838_v33, 0.0  ;;  %v981_v33 = vld [vmem:[#allocation2 + $0xb8] sm:$0xff] }
 0x91f   :  { %2147 = vmatprep.mubr.msk.f32.mxu1 %vm62_vm0, %v846_v34  ;;  %v984_v34 = vld [vmem:[#allocation2 + $0xd0] sm:$0xff] }
 0x920   :  { %2148 = vmatmul.mubr.msk.f32.vlgmr.msra.gmra.mrb[12].mxu1 %vm62_vm0, %v847_v35 }
 0x9f3   :  { %v2149_v38 = vpop.f32.mrb[12].mxu1 }
 0x9f4   :  { %v930_v39 = vadd.f32 %v2149_v38, %v851_v37  ;;  %v924_v40 = vpop.f32.mrb[13].mxu1 }
 0x9f5   :  { %v925_v41 = vadd.f32 %v924_v40, %v851_v37 }
 0x9f6   :  { %v934_v43 = vadd.f32 %v930_v39, %v760_v23  ;;  %v963_v23 = vsub.s32 3, %v2591_v46  ;;  %v2337_v39 = vpack.c.bf16 %v984_v34, %v981_v33 }
 0x9f7   :  { %v933_v44 = vadd.f32 %v925_v41, %v759_v22 }
 0x9f8   :  { %v938_v50 = vsel %vm195_vm3, %v934_v43, 0.0  ;;  %v964_v26 = vrot.slane %v2697_v27, %v963_v23  ;;  %v2785_v27 = vld [vmem:[#allocation2 + $0xd8] ss:$8 sm:$0x7] }
 0x9f9   :  { %939 = vadd.xlane.f32.xlu1 %v938_v50  ;;  %v935_v51 = vsel %vm195_vm3, %v933_v44, 0.0  ;;  %v1008_v41 = vrot.slane %v2785_v27, %v2594_v47 }
 0x9fa   :  { %936 = vadd.xlane.f32.xlu0 %v935_v51 }
 0xa86   :  { %v940_v45 = vpop.xlane.xlu1 %939 }
 0xa87   :  { %v942_v42 = vmul.f32 0.03125, %v940_v45  ;;  %v937_v53 = vpop.xlane.xlu0 %936 }
 0xa88   :  { %v941_v54 = vmul.f32 0.03125, %v937_v53 }
 0xa89   :  { %v944_v55 = vsub.f32 %v934_v43, %v942_v42 }
 0xa8a   :  { %v943_v56 = vsub.f32 %v933_v44, %v941_v54 }
 0xa8b   :  { %v946_v57 = vmul.f32 %v944_v55, %v944_v55 }
 0xa8c   :  { %v945_v58 = vmul.f32 %v943_v56, %v943_v56 }
 0xa8d   :  { %v950_v59 = vsel %vm195_vm3, %v946_v57, 0.0 }
 0xa8e   :  { %951 = vadd.xlane.f32.xlu1 %v950_v59  ;;  %v947_v62 = vsel %vm195_vm3, %v945_v58, 0.0 }
 0xa8f   :  { %948 = vadd.xlane.f32.xlu0 %v947_v62 }
 0xb1b   :  { %v952_v16 = vpop.xlane.xlu1 %951 }
 0xb1c   :  { %v954_v17 = vmul.f32 0.03125, %v952_v16  ;;  %v949_v18 = vpop.xlane.xlu0 %948 }
 0xb1d   :  { %v953_v20 = vmul.f32 0.03125, %v949_v18 }
 0xb1e   :  { %v956_v21 = vadd.f32 1e-05, %v954_v17 }
 0xb1f   :  { %v955_v22 = vadd.f32 1e-05, %v953_v20 }
 0xb20   :  { %2432 = vrsqrt.f32 %v956_v21 }
 0xb21   :  { %2434 = vrsqrt.f32 %v955_v22 }
 0xb2a   :  { %v2433_v25 = vpop.eup %2432 }
 0xb2b   :  { %v2435_v29 = vpop.eup %2434  ;;  %v960_v32 = vmul.f32 %v2433_v25, %v944_v55 }
 0xb2c   :  { %v959_v30 = vmul.f32 %v2435_v29, %v943_v56 }
 0xb2d   :  { %v966_v38 = vmul.f32 %v964_v26, %v960_v32 }
 0xb2e   :  { %v965_v35 = vmul.f32 %v964_v26, %v959_v30 }
 0xb2f   :  { %v2777_v40 = vadd.f32 %v970_v31, %v966_v38 }
 0xb30   :  { %v2772_v37 = vadd.f32 %v970_v31, %v965_v35 }
 0xb32   :  { %1922 = vmatmul.mubr.msk.f32.vlgmr.msra.gmra.mrb[8].mxu0 %vm195_vm3, %v2772_v37 }
 0xb33   :  { %2336 = vmatpush3.bf16.msra.mxu0 %v2333_v14  ;;  %1096 = vmatprep.mubr.f32.mxu0 %v2488_v10  ;;  %v1012_v10 = vrot.slane %v2785_v27, %v2599_v49 }
 0xb34   :  { %2338 = vmatprep.subr.bf16.mxu0 %v2337_v39 }
 0xb36   :  { %1923 = vmatmul.mubr.msk.f32.gmra.mrb[10].mxu0 %vm195_vm3, %v2777_v40 }
 0xb37   :  { %2340 = vmatpush3.bf16.msra.mxu0 %v2337_v39  ;;  %2158 = vmatprep.mubr.msk.f32.mxu0 %vm195_vm3, %v2772_v37 }
 0xb3a   :  { %2159 = vmatmul.mubr.msk.f32.vlgmr.msra.gmra.mrb[12].mxu0 %vm195_vm3, %v2777_v40 }
 0xc05   :  { %v1092_v43 = vpop.f32.mrb[8].mxu0 }
 0xc06   :  { %v1093_v44 = vadd.f32 %v1092_v43, %v1008_v41  ;;  %v1094_v50 = vpop.f32.mrb[9].mxu0 }
 0xc07   :  { %v1095_v51 = vadd.f32 %v1094_v50, %v1012_v10 }
 0xc08   :  { %2169 = vmatprep.mubr.msk.f32.mxu1 %vm374_vm4, %v1093_v44 }
 0xc09   :  { %v1098_v45 = vpop.f32.mrb[10].mxu0  ;;  %1185 = vrot.lane.b32.xlu0 %v1095_v51, %s2490_s2 }
 0xc0a   :  { %v1099_v42 = vadd.f32 %v1098_v45, %v1008_v41  ;;  %v1100_v53 = vpop.f32.mrb[11].mxu0 }
 0xc0b   :  { %v1101_v54 = vadd.f32 %v1100_v53, %v1012_v10  ;;  %v1016_v10 = vrot.slane %v2785_v27, %v2664_v52 }
 0xc0d   :  { %v2793_v55 = vpop.f32.mrb[12].mxu0  ;;  %1188 = vrot.lane.b32.xlu1 %v1101_v54, %s2490_s2  ;;  %1182 = vrot.lane.b32.xlu0 %v1099_v42, %s2490_s2 }
 0xc0e   :  { %v2797_v56 = vpop.f32.mrb[13].mxu0  ;;  %v1175_v43 = vadd.f32 %v2793_v55, %v1016_v10 }
 0xc11   :  { %1179 = vrot.lane.b32.xlu1 %v1093_v44, %s2490_s2  ;;  %v1170_v44 = vadd.f32 %v2797_v56, %v1016_v10  ;;  %v994_v10 = vld [vmem:[%s2950_s5 + $0xc0] sm:$0xff] }
 0xc7b   :  { %v1186_v57 = vpop.permute.xlu0 %1185 }
 0xc7c   :  { %v2341_v58 = vpack.c.bf16 %v1186_v57, %v1095_v51 }
 0xc7e   :  { %2343 = vmatprep.subr.msk.bf16.mxu1 %vm2616_vm5, %v2341_v58 }
 0xc7f   :  { %v1189_v59 = vpop.permute.xlu1 %1188  ;;  %2346 = vmatpush3.bf16.xpose.msk.msra.mxu1 %vm2616_vm5, %v2341_v58  ;;  %v1183_v1 = vpop.permute.xlu0 %1182 }
 0xc80   :  { %v2347_v62 = vpack.c.bf16 %v1189_v59, %v1101_v54 }
 0xc82   :  { %2349 = vmatprep.subr.msk.bf16.mxu1 %vm2616_vm5, %v2347_v62 }
 0xc83   :  { %v1180_v0 = vpop.permute.xlu1 %1179 }
 0xc87   :  { %2352 = vmatpush3.bf16.xpose.msk.msra.mxu1 %vm2616_vm5, %v2347_v62 }
 0xc8e   :  { %2170 = vmatmul.mubr.msk.f32.vlgmr.msra.gmra.mrb[14].mxu1 %vm374_vm4, %v1180_v0 }
 0xc8f   :  { %2172 = vmatprep.mubr.msk.f32.mxu1 %vm374_vm4, %v1099_v42 }
 0xc92   :  { %2173 = vmatmul.mubr.msk.f32.gmra.mrb[16].mxu1 %vm374_vm4, %v1183_v1 }
 0xd61   :  { %v2171_v48 = vpop.f32.mrb[14].mxu1 }
 0xd62   :  { %v1300_v2 = vmul.f32 0.25, %v2171_v48  ;;  %v1280_v60 = vpop.f32.mrb[15].mxu1 }
 0xd63   :  { %v1299_v61 = vmul.f32 0.25, %v1280_v60  ;;  %v988_v60 = vld [vmem:[%s2950_s5 + $0x90] sm:$0xff] }
 0xd64   :  { %v1304_v3 = vadd.f32 %v1300_v2, %v2634_v6  ;;  %v987_v2 = vld [vmem:[%s2950_s5 + $0x88] sm:$0xff] }
 0xd65   :  { %v2174_v4 = vpop.f32.mrb[16].mxu1  ;;  %v1303_v5 = vadd.f32 %v1299_v61, %v2639_v9  ;;  %v2361_v61 = vpack.c.bf16 %v988_v60, %v987_v2 }
 0xd66   :  { %v1302_v7 = vmul.f32 0.25, %v2174_v4  ;;  %v1290_v63 = vpop.f32.mrb[17].mxu1  ;;  %v1310_v8 = vsel %vm195_vm3, %v1304_v3, -inf  ;;  %v990_v4 = vld [vmem:[%s2950_s5 + $0xa0] sm:$0xff] }
 0xd67   :  { %v1301_v11 = vmul.f32 0.25, %v1290_v63  ;;  %1311 = vmax.xlane.f32.xlu0 %v1310_v8  ;;  %v1307_v12 = vsel %vm195_vm3, %v1303_v5, -inf }
 0xd68   :  { %1308 = vmax.xlane.f32.xlu1 %v1307_v12  ;;  %v1306_v13 = vadd.f32 %v1302_v7, %v2646_v15 }
 0xd69   :  { %v1305_v14 = vadd.f32 %v1301_v11, %v2652_v19 }
 0xd6a   :  { %v1316_v16 = vsel %vm195_vm3, %v1306_v13, -inf }
 0xd6b   :  { %v1313_v6 = vsel %vm195_vm3, %v1305_v14, -inf }
 0xd6c   :  { %1317 = vmax.xlane.f32.xlu1 %v1316_v16  ;;  %1314 = vmax.xlane.f32.xlu0 %v1313_v6  ;;  %v2854_v6 = vld [vmem:[%s2950_s5 + $0x108] sm:$0xff] }
 0xdf4   :  { %v1312_v9 = vpop.xlane.xlu0 %1311 }
 0xdf5   :  { %v1320_v17 = vsub.f32 %v1304_v3, %v1312_v9  ;;  %v1309_v18 = vpop.xlane.xlu1 %1308  ;;  %v989_v3 = vld [vmem:[%s2950_s5 + $0x98] sm:$0xff]  ;;  %v1461_v9 = vrot.slane %v2854_v6, %v2594_v47 }
 0xdf6   :  { %v1319_v20 = vsub.f32 %v1303_v5, %v1309_v18  ;;  %v2365_v5 = vpack.c.bf16 %v990_v4, %v989_v3  ;;  %v1580_v3 = vrot.slane %v2854_v6, %v2664_v52  ;;  %v1586_v52 = vrot.slane %v2854_v6, %v763_v28 }
 0xdf7   :  { %v1325_v21 = vmul.f32 1.442695, %v1320_v17 }
 0xdf8   :  { %v1323_v22 = vmul.f32 1.442695, %v1319_v20 }
 0xdf9   :  { %2436 = vpow2.f32 %v1325_v21  ;;  %v1318_v25 = vpop.xlane.xlu1 %1317  ;;  %v1315_v26 = vpop.xlane.xlu0 %1314 }
 0xdfa   :  { %2438 = vpow2.f32 %v1323_v22  ;;  %v1322_v29 = vsub.f32 %v1306_v13, %v1318_v25  ;;  %v1321_v15 = vsub.f32 %v1305_v14, %v1315_v26 }
 0xdfc   :  { %v1329_v30 = vmul.f32 1.442695, %v1322_v29  ;;  %v1327_v19 = vmul.f32 1.442695, %v1321_v15 }
 0xdfe   :  { %2440 = vpow2.f32 %v1329_v30 }
 0xdff   :  { %2442 = vpow2.f32 %v1327_v19 }
 0xe03   :  { %v2437_v31 = vpop.eup %2436 }
 0xe04   :  { %v2439_v32 = vpop.eup %2438  ;;  %v1334_v33 = vsel %vm195_vm3, %v2437_v31, 0.0 }
 0xe05   :  { %1335 = vadd.xlane.f32.xlu1 %v1334_v33  ;;  %v1331_v34 = vsel %vm195_vm3, %v2439_v32, 0.0 }
 0xe06   :  { %1332 = vadd.xlane.f32.xlu0 %v1331_v34 }
 0xe08   :  { %v2441_v35 = vpop.eup %2440 }
 0xe09   :  { %v2443_v38 = vpop.eup %2442  ;;  %v1340_v39 = vsel %vm195_vm3, %v2441_v35, 0.0 }
 0xe0a   :  { %1341 = vadd.xlane.f32.xlu1 %v1340_v39  ;;  %v1337_v41 = vsel %vm195_vm3, %v2443_v38, 0.0 }
 0xe0b   :  { %1338 = vadd.xlane.f32.xlu0 %v1337_v41  ;;  %v993_v41 = vld [vmem:[%s2950_s5 + $0xb8] sm:$0xff] }
 0xe1b   :  { %1195 = vrot.lane.b32.xlu1 %v1175_v43, %s2490_s2 }
 0xe21   :  { %1191 = vrot.lane.b32.xlu0 %v1170_v44, %s2490_s2 }
 0xe92   :  { %v1336_v50 = vpop.xlane.xlu1 %1335 }
 0xe93   :  { %v1333_v51 = vpop.xlane.xlu0 %1332 }
 0xe94   :  { %2444 = vrcp.f32 %v1333_v51  ;;  %v997_v51 = vld [vmem:[%s2950_s5 + $0xd8] sm:$0xff] }
 0xe95   :  { %2446 = vrcp.f32 %v1336_v50  ;;  %v996_v50 = vld [vmem:[%s2950_s5 + $0xd0] sm:$0xff] }
 0xe97   :  { %v1342_v45 = vpop.xlane.xlu1 %1341 }
 0xe98   :  { %v1339_v42 = vpop.xlane.xlu0 %1338 }
 0xe99   :  { %2448 = vrcp.f32 %v1339_v42  ;;  %v998_v42 = vld [vmem:[%s2950_s5 + $0xe0] sm:$0xff] }
 0xe9a   :  { %2450 = vrcp.f32 %v1342_v45 }
 0xe9b   :  { %v1196_v53 = vpop.permute.xlu1 %1195 }
 0xe9c   :  { %v1192_v54 = vpop.permute.xlu0 %1191  ;;  %v2357_v58 = vpack.c.bf16 %v1196_v53, %v1175_v43  ;;  %v2373_v43 = vpack.c.bf16 %v994_v10, %v993_v41  ;;  %v2381_v53 = vpack.c.bf16 %v998_v42, %v997_v51  ;;  %v1797_v41 = vld [vmem:[%s2950_s5 + $0x120] sm:$0xff]  ;;  %v1798_v10 = vld [vmem:[%s2950_s5 + $0x128] sm:$0xff] }
 0xe9d   :  { %v2353_v57 = vpack.c.bf16 %v1192_v54, %v1170_v44  ;;  %v995_v44 = vld [vmem:[%s2950_s5 + $0xc8] sm:$0xff] }
 0xe9e   :  { %v2445_v27 = vpop.eup %2444  ;;  %v2377_v45 = vpack.c.bf16 %v996_v50, %v995_v44  ;;  %v999_v54 = vld [vmem:[%s2950_s5 + $0xe8] sm:$0xff] }
 0xe9f   :  { %2354 = vmatprep.subr.bf16.mxu0 %v2353_v57  ;;  %v1344_v55 = vmul.f32 %v2445_v27, %v2439_v32  ;;  %v2447_v56 = vpop.eup %2446 }
 0xea0   :  { %2356 = vmatpush3.bf16.msra.mxu0 %v2353_v57  ;;  %v1346_v62 = vmul.f32 %v2447_v56, %v2437_v31  ;;  %v1000_v57 = vld [vmem:[%s2950_s5 + $0xf0] sm:$0xff] }
 0xea1   :  { %2358 = vmatprep.subr.bf16.mxu0 %v2357_v58  ;;  %2183 = vmatprep.mubr.msk.f32.mxu0 %vm195_vm3, %v1344_v55  ;;  %v2385_v27 = vpack.c.bf16 %v1000_v57, %v999_v54  ;;  %v1786_v54 = vrot.slane %v2854_v6, %v963_v23  ;;  %v1944_v23 = vld [vmem:[%s2950_s5 + $0x130] ss:$0 sm:$0xff] }
 0xea3   :  { %v2449_v59 = vpop.eup %2448 }
 0xea4   :  { %2360 = vmatpush3.bf16.msra.mxu0 %v2357_v58  ;;  %v2451_v0 = vpop.eup %2450  ;;  %v1348_v1 = vmul.f32 %v2449_v59, %v2443_v38  ;;  %v992_v38 = vld [vmem:[%s2950_s5 + $0xb0] sm:$0xff] }
 0xea5   :  { %v1350_v48 = vmul.f32 %v2451_v0, %v2441_v35  ;;  %2362 = vmatprep.subr.bf16.mxu0 %v2361_v61 }
 0xea7   :  { %2184 = vmatmul.mubr.msk.f32.vlgmr.msra.gmra.mrb[14].mxu0 %vm195_vm3, %v1346_v62 }
 0xea8   :  { %2186 = vmatprep.mubr.msk.f32.mxu0 %vm195_vm3, %v1348_v1  ;;  %2364 = vmatpush3.bf16.msra.mxu0 %v2361_v61  ;;  %v1574_v1 = vrot.slane %v2854_v6, %v2599_v49  ;;  %v1002_v49 = vld [vmem:[%s2950_s5 + $0x100] sm:$0xff] }
 0xea9   :  { %2366 = vmatprep.subr.bf16.mxu0 %v2365_v5 }
 0xeab   :  { %2187 = vmatmul.mubr.msk.f32.gmra.mrb[16].mxu0 %vm195_vm3, %v1350_v48 }
 0xeac   :  { %2368 = vmatpush3.bf16.msra.mxu0 %v2365_v5 }
 0xead   :  { %2378 = vmatprep.subr.bf16.mxu0 %v2377_v45 }
 0xf7a   :  { %v2185_v7 = vpop.f32.mrb[14].mxu0 }
 0xf7b   :  { %1449 = vrot.lane.b32.xlu1 %v2185_v7, %s2491_s0  ;;  %v1429_v63 = vpop.f32.mrb[15].mxu0 }
 0xf7e   :  { %v2188_v8 = vpop.f32.mrb[16].mxu0 }
 0xf7f   :  { %1454 = vrot.lane.b32.xlu0 %v2188_v8, %s2491_s0  ;;  %v1439_v11 = vpop.f32.mrb[17].mxu0  ;;  %v1001_v8 = vld [vmem:[%s2950_s5 + $0xf8] sm:$0xff] }
 0xfed   :  { %v1450_v12 = vpop.permute.xlu1 %1449 }
 0xfee   :  { %v1452_v13 = vsel %vm374_vm4, %v1429_v63, %v1450_v12 }
 0xfef   :  { %2197 = vmatprep.mubr.msk.f32.mxu0 %vm195_vm3, %v1452_v13 }
 0xff1   :  { %v1455_v14 = vpop.permute.xlu0 %1454 }
 0xff2   :  { %v1457_v16 = vsel %vm374_vm4, %v1439_v11, %v1455_v14  ;;  %v2389_v11 = vpack.c.bf16 %v1002_v49, %v1001_v8 }
 0xff3   :  { %2198 = vmatmul.mubr.msk.f32.vlgmr.msra.gmra.mrb[18].mxu0 %vm195_vm3, %v1457_v16 }
 0xff4   :  { %2380 = vmatpush3.bf16.msra.mxu0 %v2377_v45 }
 0xff5   :  { %2382 = vmatprep.subr.bf16.mxu0 %v2381_v53 }
 0xff8   :  { %2384 = vmatpush3.bf16.msra.mxu0 %v2381_v53 }
 0xff9   :  { %2386 = vmatprep.subr.bf16.mxu0 %v2385_v27 }
 0xffc   :  { %2388 = vmatpush3.bf16.msra.mxu0 %v2385_v27 }
 0xffd   :  { %2390 = vmatprep.subr.bf16.mxu0 %v2389_v11 }
0x1000   :  { %2392 = vmatpush3.bf16.msra.mxu0 %v2389_v11 }
0x10c6   :  { %v2199_v17 = vpop.f32.mrb[18].mxu0 }
0x10c7   :  { %v1540_v18 = vadd.f32 %v2199_v17, %v1461_v9  ;;  %v1534_v20 = vpop.f32.mrb[19].mxu0 }
0x10c8   :  { %v1535_v21 = vadd.f32 %v1534_v20, %v1461_v9 }
0x10c9   :  { %v1544_v22 = vadd.f32 %v1540_v18, %v2777_v40  ;;  %v1673_v18 = vrot.slane %v2854_v6, %v850_v36 }
0x10ca   :  { %v1543_v25 = vadd.f32 %v1535_v21, %v2772_v37  ;;  %v991_v37 = vld [vmem:[%s2950_s5 + $0xa8] sm:$0xff] }
0x10cb   :  { %v1548_v26 = vsel %vm195_vm3, %v1544_v22, 0.0  ;;  %v2369_v39 = vpack.c.bf16 %v992_v38, %v991_v37  ;;  %v1795_v37 = vld [vmem:[%s2950_s5 + $0x110] sm:$0xff]  ;;  %v1796_v38 = vld [vmem:[%s2950_s5 + $0x118] sm:$0xff] }
0x10cc   :  { %1549 = vadd.xlane.f32.xlu0 %v1548_v26  ;;  %v1545_v29 = vsel %vm195_vm3, %v1543_v25, 0.0 }
0x10cd   :  { %1546 = vadd.xlane.f32.xlu1 %v1545_v29  ;;  %2370 = vmatprep.subr.bf16.mxu1 %v2369_v39 }
0x10ce   :  { %2372 = vmatpush3.bf16.msra.mxu1 %v2369_v39  ;;  %v2393_v39 = vpack.c.bf16 %v1796_v38, %v1795_v37 }
0x10cf   :  { %2374 = vmatprep.subr.bf16.mxu1 %v2373_v43 }
0x10d2   :  { %2376 = vmatpush3.bf16.msra.mxu1 %v2373_v43  ;;  %v2397_v43 = vpack.c.bf16 %v1798_v10, %v1797_v41 }
0x10d3   :  { %2394 = vmatprep.subr.bf16.mxu1 %v2393_v39 }
0x1159   :  { %v1550_v15 = vpop.xlane.xlu0 %1549 }
0x115a   :  { %v1552_v30 = vmul.f32 0.03125, %v1550_v15  ;;  %v1547_v19 = vpop.xlane.xlu1 %1546 }
0x115b   :  { %v1551_v31 = vmul.f32 0.03125, %v1547_v19 }
0x115c   :  { %v1554_v32 = vsub.f32 %v1544_v22, %v1552_v30 }
0x115d   :  { %v1553_v47 = vsub.f32 %v1543_v25, %v1551_v31 }
0x115e   :  { %v1556_v33 = vmul.f32 %v1554_v32, %v1554_v32 }
0x115f   :  { %v1555_v34 = vmul.f32 %v1553_v47, %v1553_v47 }
0x1160   :  { %v1560_v35 = vsel %vm195_vm3, %v1556_v33, 0.0 }
0x1161   :  { %1561 = vadd.xlane.f32.xlu1 %v1560_v35  ;;  %v1557_v40 = vsel %vm195_vm3, %v1555_v34, 0.0 }
0x1162   :  { %1558 = vadd.xlane.f32.xlu0 %v1557_v40 }
0x11ee   :  { %v1562_v58 = vpop.xlane.xlu1 %1561 }
0x11ef   :  { %v1564_v55 = vmul.f32 0.03125, %v1562_v58  ;;  %v1559_v56 = vpop.xlane.xlu0 %1558 }
0x11f0   :  { %v1563_v59 = vmul.f32 0.03125, %v1559_v56  ;;  %v1792_v56 = vrot.slane %v2854_v6, %v969_v24 }
0x11f1   :  { %v1566_v62 = vadd.f32 1e-05, %v1564_v55 }
0x11f2   :  { %v1565_v0 = vadd.f32 1e-05, %v1563_v59 }
0x11f3   :  { %2452 = vrsqrt.f32 %v1566_v62 }
0x11f4   :  { %2454 = vrsqrt.f32 %v1565_v0 }
0x11fd   :  { %v2453_v48 = vpop.eup %2452 }
0x11fe   :  { %v2455_v2 = vpop.eup %2454  ;;  %v1570_v60 = vmul.f32 %v2453_v48, %v1554_v32 }
0x11ff   :  { %v1569_v61 = vmul.f32 %v2455_v2, %v1553_v47 }
0x1200   :  { %v1576_v4 = vmul.f32 %v1574_v1, %v1570_v60 }
0x1201   :  { %v1575_v5 = vmul.f32 %v1574_v1, %v1569_v61 }
0x1202   :  { %v1582_v63 = vadd.f32 %v1580_v3, %v1576_v4 }
0x1203   :  { %v1581_v7 = vadd.f32 %v1580_v3, %v1575_v5 }
0x1205   :  { %2208 = vmatprep.mubr.msk.f32.mxu1 %vm195_vm3, %v1581_v7 }
0x1206   :  { %2209 = vmatmul.mubr.msk.f32.vlgmr.msra.gmra.mrb[18].mxu1 %vm195_vm3, %v1582_v63 }
0x1207   :  { %2396 = vmatpush3.bf16.msra.mxu1 %v2393_v39 }
0x1208   :  { %2398 = vmatprep.subr.bf16.mxu1 %v2397_v43 }
0x120b   :  { %2400 = vmatpush3.bf16.msra.mxu1 %v2397_v43 }
0x12d9   :  { %v2210_v12 = vpop.f32.mrb[18].mxu1 }
0x12da   :  { %v1665_v13 = vadd.f32 %v2210_v12, %v1586_v52  ;;  %v1659_v14 = vpop.f32.mrb[19].mxu1 }
0x12db   :  { %v1660_v16 = vadd.f32 %v1659_v14, %v1586_v52 }
0x12dc   :  { %v1669_v17 = vmax.f32 %v1665_v13, 0.0 }
0x12dd   :  { %v1668_v9 = vmax.f32 %v1660_v16, 0.0 }
0x12df   :  { %2227 = vmatprep.mubr.msk.f32.mxu0 %vm62_vm0, %v1668_v9 }
0x12e0   :  { %2228 = vmatmul.mubr.msk.f32.vlgmr.msra.gmra.mrb[20].mxu0 %vm62_vm0, %v1669_v17 }
0x13b3   :  { %v2229_v20 = vpop.f32.mrb[20].mxu0 }
0x13b4   :  { %v1752_v21 = vadd.f32 %v2229_v20, %v1673_v18  ;;  %v1746_v22 = vpop.f32.mrb[21].mxu0 }
0x13b5   :  { %v1747_v25 = vadd.f32 %v1746_v22, %v1673_v18 }
0x13b6   :  { %v1756_v26 = vadd.f32 %v1752_v21, %v1582_v63 }
0x13b7   :  { %v1755_v28 = vadd.f32 %v1747_v25, %v1581_v7 }
0x13b8   :  { %v1760_v29 = vsel %vm195_vm3, %v1756_v26, 0.0 }
0x13b9   :  { %1761 = vadd.xlane.f32.xlu1 %v1760_v29  ;;  %v1757_v15 = vsel %vm195_vm3, %v1755_v28, 0.0 }
0x13ba   :  { %1758 = vadd.xlane.f32.xlu0 %v1757_v15 }
0x1446   :  { %v1762_v30 = vpop.xlane.xlu1 %1761 }
0x1447   :  { %v1764_v19 = vmul.f32 0.03125, %v1762_v30  ;;  %v1759_v31 = vpop.xlane.xlu0 %1758 }
0x1448   :  { %v1763_v32 = vmul.f32 0.03125, %v1759_v31 }
0x1449   :  { %v1766_v47 = vsub.f32 %v1756_v26, %v1764_v19 }
0x144a   :  { %v1765_v33 = vsub.f32 %v1755_v28, %v1763_v32 }
0x144b   :  { %v1768_v34 = vmul.f32 %v1766_v47, %v1766_v47 }
0x144c   :  { %v1767_v36 = vmul.f32 %v1765_v33, %v1765_v33 }
0x144d   :  { %v1772_v35 = vsel %vm195_vm3, %v1768_v34, 0.0 }
0x144e   :  { %1773 = vadd.xlane.f32.xlu1 %v1772_v35  ;;  %v1769_v40 = vsel %vm195_vm3, %v1767_v36, 0.0 }
0x144f   :  { %1770 = vadd.xlane.f32.xlu0 %v1769_v40 }
0x14db   :  { %v1774_v44 = vpop.xlane.xlu1 %1773 }
0x14dc   :  { %v1776_v50 = vmul.f32 0.03125, %v1774_v44  ;;  %v1771_v51 = vpop.xlane.xlu0 %1770 }
0x14dd   :  { %v1775_v45 = vmul.f32 0.03125, %v1771_v51 }
0x14de   :  { %v1778_v42 = vadd.f32 1e-05, %v1776_v50 }
0x14df   :  { %v1777_v53 = vadd.f32 1e-05, %v1775_v45 }
0x14e0   :  { %2456 = vrsqrt.f32 %v1778_v42 }
0x14e1   :  { %2458 = vrsqrt.f32 %v1777_v53 }
0x14ea   :  { %v2457_v57 = vpop.eup %2456 }
0x14eb   :  { %v2459_v27 = vpop.eup %2458  ;;  %v1782_v58 = vmul.f32 %v2457_v57, %v1766_v47 }
0x14ec   :  { %v1781_v55 = vmul.f32 %v2459_v27, %v1765_v33 }
0x14ed   :  { %v1788_v59 = vmul.f32 %v1786_v54, %v1782_v58 }
0x14ee   :  { %v1787_v62 = vmul.f32 %v1786_v54, %v1781_v55 }
0x14ef   :  { %v1794_v1 = vadd.f32 %v1792_v56, %v1788_v59 }
0x14f0   :  { %v1793_v0 = vadd.f32 %v1792_v56, %v1787_v62 }
0x14f2   :  { %2238 = vmatprep.mubr.msk.f32.mxu1 %vm195_vm3, %v1793_v0 }
0x14f3   :  { %2239 = vmatmul.mubr.msk.f32.vlgmr.msra.gmra.mrb[20].mxu1 %vm195_vm3, %v1794_v1 }
0x15c6   :  { %v2240_v48 = vpop.f32.mrb[20].mxu1 }
0x15c7   :  { %v1882_v2 = vadd.f32 %v2240_v48, %v1944_v23  ;;  %v1876_v60 = vpop.f32.mrb[21].mxu1 }
0x15c8   :  { %v1877_v61 = vadd.f32 %v1944_v23, %v1876_v60 }
0x15c9   :  { %1886 = vrot.lane.b32.xlu0 %v1882_v2, %s2492_s7 }
0x163b   :  { %v1887_v46 = vpop.permute.xlu0 %1886 }
0x163c   :  { %v1889_v24 = vsel %vm62_vm0, %v1877_v61, %v1887_v46 }
0x163d   :  { %1890 = vst [vmem:[%s2951_s6] sm:$0xff] %v1889_v24 }
0x163e   :  { %1895 = vsyncpa [#allocation3], 1 }

</bundles_post_ra>
